<compile_context>
chip_gen: v7x
topology: tpu7x:2x2x1
jax: 0.10.0
libtpu: 0.0.40
codegen_flags: <defaults>
</compile_context>

<pallas_src>
import math

import jax
import jax.numpy as jnp
from jax.experimental import pallas as pl
from jax.experimental.pallas import tpu as pltpu

_INV_SQRT2 = 0.7071067811865476


def _mptmlp_kernel(x_ref, wu_ref, bu_ref, wd_ref, bd_ref, o_ref, acc_ref):
    j = pl.program_id(1)

    @pl.when(j == 0)
    def _():
        acc_ref[...] = jnp.zeros_like(acc_ref)

    # Up projection slab: (tm, th) = (tm, d_model) @ (d_model, th), f32 acc on MXU.
    h = jnp.dot(x_ref[...], wu_ref[...], preferred_element_type=jnp.float32)
    h = h + bu_ref[...]
    # Exact (erf-based) GELU in f32 — matches nn.GELU(approximate='none').
    h = 0.5 * h * (1.0 + jax.lax.erf(h * _INV_SQRT2))
    # Partial down projection for this hidden block, accumulated in f32.
    acc_ref[...] += jnp.dot(h.astype(wd_ref.dtype), wd_ref[...],
                            preferred_element_type=jnp.float32)

    @pl.when(j == pl.num_programs(1) - 1)
    def _():
        o_ref[...] = (acc_ref[...] + bd_ref[...]).astype(o_ref.dtype)


def mptmlp_forward(x, w_up, b_up, w_down, b_down, *, tm=256, th=512):
    """x: (..., d_model) -> (..., d_model). Hot path runs inside Pallas."""
    orig_shape = x.shape
    out_dtype = x.dtype
    d_model = orig_shape[-1]
    hidden = w_up.shape[1]

    x2d = x.reshape(-1, d_model)
    M = x2d.shape[0]

    # Pad the row count up to a whole number of tiles (no hard divisibility
    # restriction on callers); padded rows are sliced off after the call.
    num_m = pl.cdiv(M, tm)
    m_pad = num_m * tm
    if m_pad != M:
        x2d = jnp.pad(x2d, ((0, m_pad - M), (0, 0)))

    # Hidden reduction tile must divide hidden; fall back to one block.
    if hidden % th != 0:
        th = hidden
    num_h = hidden // th

    # bf16 operands on the MXU path; biases stay f32 (added post-accumulation).
    xb = x2d.astype(jnp.bfloat16)
    wub = w_up.astype(jnp.bfloat16)
    wdb = w_down.astype(jnp.bfloat16)
    bu2 = b_up.reshape(1, hidden).astype(jnp.float32)
    bd2 = b_down.reshape(1, d_model).astype(jnp.float32)

    out_itemsize = jnp.dtype(out_dtype).itemsize
    # VMEM budget estimate: double-buffered input/output tiles + f32 accumulator.
    buf_bytes = (tm * d_model * 2          # x tile (bf16)
                 + d_model * th * 2        # w_up tile (bf16)
                 + th * 4                  # b_up tile (f32)
                 + th * d_model * 2        # w_down tile (bf16)
                 + d_model * 4             # b_down tile (f32)
                 + tm * d_model * out_itemsize)
    vmem_bytes = 2 * buf_bytes + tm * d_model * 4
    vmem_limit = int(min(64 * 1024 * 1024, max(32 * 1024 * 1024, 2 * vmem_bytes)))

    cost = pl.CostEstimate(
        flops=4 * m_pad * d_model * hidden,            # two matmuls
        transcendentals=m_pad * hidden,                # erf
        bytes_accessed=(xb.size * 2 + wub.size * 2 + wdb.size * 2
                        + bu2.size * 4 + bd2.size * 4
                        + m_pad * d_model * out_itemsize),
    )

    out = pl.pallas_call(
        _mptmlp_kernel,
        out_shape=jax.ShapeDtypeStruct((m_pad, d_model), out_dtype),
        grid=(num_m, num_h),
        in_specs=[
            pl.BlockSpec((tm, d_model), lambda i, j: (i, 0)),    # x row tile
            pl.BlockSpec((d_model, th), lambda i, j: (0, j)),    # w_up column block
            pl.BlockSpec((1, th), lambda i, j: (0, j)),          # b_up block
            pl.BlockSpec((th, d_model), lambda i, j: (j, 0)),    # w_down row block
            pl.BlockSpec((1, d_model), lambda i, j: (0, 0)),     # b_down
        ],
        out_specs=pl.BlockSpec((tm, d_model), lambda i, j: (i, 0)),
        scratch_shapes=[pltpu.VMEM((tm, d_model), jnp.float32)],
        compiler_params=pltpu.CompilerParams(
            dimension_semantics=("parallel", "arbitrary"),
            vmem_limit_bytes=vmem_limit),
        cost_estimate=cost,
    )(xb, wub, bu2, wdb, bd2)

    if m_pad != M:
        out = out[:M]
    return out.reshape(orig_shape)


def _reference(x, w_up, b_up, w_down, b_down):
    # Mirrors the kernel numerics: bf16 MXU operands, f32 accumulation/bias/GELU.
    h = jnp.dot(x.astype(jnp.bfloat16), w_up.astype(jnp.bfloat16),
                preferred_element_type=jnp.float32) + b_up
    h = 0.5 * h * (1.0 + jax.lax.erf(h * _INV_SQRT2))
    y = jnp.dot(h.astype(jnp.bfloat16), w_down.astype(jnp.bfloat16),
                preferred_element_type=jnp.float32) + b_down
    return y.astype(x.dtype)


if __name__ == "__main__":
    # Module config: d_model=128, expansion_ratio=4 -> hidden=512.
    d_model = 128
    expansion_ratio = 4
    hidden = expansion_ratio * d_model
    batch, seq = 2, 200   # M = 400 -> exercises the padded last row tile

    key = jax.random.PRNGKey(0)
    kx, ku, kbu, kd, kbd = jax.random.split(key, 5)

    # Deterministic init mirroring nn.Linear's uniform(-1/sqrt(fan_in), ...).
    lim_up = 1.0 / math.sqrt(d_model)
    lim_dn = 1.0 / math.sqrt(hidden)
    # Stored as (in_features, out_features), i.e. transposed vs. PyTorch.
    w_up = jax.random.uniform(ku, (d_model, hidden), jnp.float32, -lim_up, lim_up)
    b_up = jax.random.uniform(kbu, (hidden,), jnp.float32, -lim_up, lim_up)
    w_down = jax.random.uniform(kd, (hidden, d_model), jnp.float32, -lim_dn, lim_dn)
    b_down = jax.random.uniform(kbd, (d_model,), jnp.float32, -lim_dn, lim_dn)

    x = jax.random.normal(kx, (batch, seq, d_model), jnp.float32)

    # th=256 -> two reduction steps over hidden to exercise the accumulator path.
    y = mptmlp_forward(x, w_up, b_up, w_down, b_down, tm=256, th=256)
    y = jax.block_until_ready(y)

    y_ref = _reference(x, w_up, b_up, w_down, b_down)
    assert y.shape == (batch, seq, d_model)
    max_err = float(jnp.max(jnp.abs(y - y_ref)))
    assert jnp.allclose(y, y_ref, atol=5e-3, rtol=5e-3), (
        f"mismatch vs reference (max abs err {max_err})")

    print("KERNEL_OK")
</pallas_src>

<mosaic_0001>
module attributes {stable_mosaic.version = 11 : i64} {
  func.func @_mptmlp_kernel(%arg0: i32, %arg1: i32, %arg2: memref<256x128xbf16, #tpu.memory_space<vmem>>, %arg3: memref<128x256xbf16, #tpu.memory_space<vmem>>, %arg4: memref<1x256xf32, #tpu.memory_space<vmem>>, %arg5: memref<256x128xbf16, #tpu.memory_space<vmem>>, %arg6: memref<1x128xf32, #tpu.memory_space<vmem>>, %arg7: memref<256x128xf32, #tpu.memory_space<vmem>>, %arg8: memref<256x128xf32, #tpu.memory_space<vmem>>) attributes {dimension_semantics = [#tpu.dimension_semantics<parallel>, #tpu.dimension_semantics<arbitrary>], iteration_bounds = array<i64: 2, 2>, scalar_prefetch = 0 : i64, scratch_operands = 1 : i64, tpu.core_type = #tpu.core_type<tc>, window_params = [{transform_indices = @transform_0, window_bounds = array<i64: 256, 128>}, {transform_indices = @transform_1, window_bounds = array<i64: 128, 256>}, {transform_indices = @transform_2, window_bounds = array<i64: 1, 256>}, {transform_indices = @transform_3, window_bounds = array<i64: 256, 128>}, {pipeline_mode = #tpu.pipeline_mode<synchronous>, transform_indices = @transform_4, window_bounds = array<i64: 1, 128>}, {transform_indices = @transform_5, window_bounds = array<i64: 256, 128>}]} {
    %c0_i32 = arith.constant 0 : i32
    %0 = arith.cmpi eq, %arg1, %c0_i32 : i32
    %1 = arith.extui %0 : i1 to i32
    %c0_i32_0 = arith.constant 0 : i32
    %2 = arith.cmpi ne, %1, %c0_i32_0 : i32
    scf.if %2 {
      %cst_17 = arith.constant 0.000000e+00 : f32
      %26 = vector.broadcast %cst_17 : f32 to vector<256x128xf32>
      %c0_18 = arith.constant 0 : index
      %c0_19 = arith.constant 0 : index
      %27 = vector.load %arg8[%c0_18, %c0_19] : memref<256x128xf32, #tpu.memory_space<vmem>>, vector<256x128xf32>
      tpu.vector_store %arg8[%c0_18, %c0_19], %26 {strides = array<i32>} : memref<256x128xf32, #tpu.memory_space<vmem>>, vector<256x128xf32>,
    } else {
    }
    %c0 = arith.constant 0 : index
    %c0_1 = arith.constant 0 : index
    %3 = vector.load %arg2[%c0, %c0_1] : memref<256x128xbf16, #tpu.memory_space<vmem>>, vector<256x128xbf16>
    %c0_2 = arith.constant 0 : index
    %c0_3 = arith.constant 0 : index
    %4 = vector.load %arg3[%c0_2, %c0_3] : memref<128x256xbf16, #tpu.memory_space<vmem>>, vector<128x256xbf16>
    %cst = arith.constant dense<0.000000e+00> : vector<256x256xf32>
    %5 = tpu.matmul %3, %4, %cst {dimension_numbers = #tpu.dot_dimension_numbers<[1], [0], [0], [1], [0, 0, 1, 1], [], []>} : vector<256x128xbf16>, vector<128x256xbf16>, vector<256x256xf32> -> vector<256x256xf32>
    %c0_4 = arith.constant 0 : index
    %c0_5 = arith.constant 0 : index
    %6 = vector.load %arg4[%c0_4, %c0_5] : memref<1x256xf32, #tpu.memory_space<vmem>>, vector<1x256xf32>
    %7 = vector.broadcast %6 : vector<1x256xf32> to vector<256x256xf32>
    %8 = arith.addf %5, %7 : vector<256x256xf32>
    %cst_6 = arith.constant 5.000000e-01 : f32
    %9 = vector.broadcast %cst_6 : f32 to vector<256x256xf32>
    %10 = arith.mulf %9, %8 : vector<256x256xf32>
    %cst_7 = arith.constant 0.707106769 : f32
    %11 = vector.broadcast %cst_7 : f32 to vector<256x256xf32>
    %12 = arith.mulf %8, %11 : vector<256x256xf32>
    %13 = math.erf %12 : vector<256x256xf32>
    %cst_8 = arith.constant 1.000000e+00 : f32
    %14 = vector.broadcast %cst_8 : f32 to vector<256x256xf32>
    %15 = arith.addf %14, %13 : vector<256x256xf32>
    %16 = arith.mulf %10, %15 : vector<256x256xf32>
    %c0_9 = arith.constant 0 : index
    %c0_10 = arith.constant 0 : index
    %17 = vector.load %arg8[%c0_9, %c0_10] : memref<256x128xf32, #tpu.memory_space<vmem>>, vector<256x128xf32>
    %18 = arith.truncf %16 : vector<256x256xf32> to vector<256x256xbf16>
    %c0_11 = arith.constant 0 : index
    %c0_12 = arith.constant 0 : index
    %19 = vector.load %arg5[%c0_11, %c0_12] : memref<256x128xbf16, #tpu.memory_space<vmem>>, vector<256x128xbf16>
    %cst_13 = arith.constant dense<0.000000e+00> : vector<256x128xf32>
    %20 = tpu.matmul %18, %19, %cst_13 {dimension_numbers = #tpu.dot_dimension_numbers<[1], [0], [0], [1], [0, 0, 1, 1], [], []>} : vector<256x256xbf16>, vector<256x128xbf16>, vector<256x128xf32> -> vector<256x128xf32>
    %21 = arith.addf %17, %20 : vector<256x128xf32>
    %c0_14 = arith.constant 0 : index
    %c0_15 = arith.constant 0 : index
    %22 = vector.load %arg8[%c0_14, %c0_15] : memref<256x128xf32, #tpu.memory_space<vmem>>, vector<256x128xf32>
    tpu.vector_store %arg8[%c0_14, %c0_15], %21 {strides = array<i32>} : memref<256x128xf32, #tpu.memory_space<vmem>>, vector<256x128xf32>,
    %c1_i32 = arith.constant 1 : i32
    %23 = arith.cmpi eq, %arg1, %c1_i32 : i32
    %24 = arith.extui %23 : i1 to i32
    %c0_i32_16 = arith.constant 0 : i32
    %25 = arith.cmpi ne, %24, %c0_i32_16 : i32
    scf.if %25 {
      %c0_17 = arith.constant 0 : index
      %c0_18 = arith.constant 0 : index
      %26 = vector.load %arg8[%c0_17, %c0_18] : memref<256x128xf32, #tpu.memory_space<vmem>>, vector<256x128xf32>
      %c0_19 = arith.constant 0 : index
      %c0_20 = arith.constant 0 : index
      %27 = vector.load %arg6[%c0_19, %c0_20] : memref<1x128xf32, #tpu.memory_space<vmem>>, vector<1x128xf32>
      %28 = vector.broadcast %27 : vector<1x128xf32> to vector<256x128xf32>
      %29 = arith.addf %26, %28 : vector<256x128xf32>
      %c0_21 = arith.constant 0 : index
      %c0_22 = arith.constant 0 : index
      %30 = vector.load %arg7[%c0_21, %c0_22] : memref<256x128xf32, #tpu.memory_space<vmem>>, vector<256x128xf32>
      tpu.vector_store %arg7[%c0_21, %c0_22], %29 {strides = array<i32>} : memref<256x128xf32, #tpu.memory_space<vmem>>, vector<256x128xf32>,
    } else {
    }
    return
  }
  func.func @transform_0(%arg0: i32, %arg1: i32) -> (i32, i32) {
    %c0_i32 = arith.constant 0 : i32
    %c0_i32_0 = arith.constant 0 : i32
    return %arg0, %c0_i32 : i32, i32
  }
  func.func @transform_1(%arg0: i32, %arg1: i32) -> (i32, i32) {
    %c0_i32 = arith.constant 0 : i32
    %c0_i32_0 = arith.constant 0 : i32
    return %c0_i32, %arg1 : i32, i32
  }
  func.func @transform_2(%arg0: i32, %arg1: i32) -> (i32, i32) {
    %c0_i32 = arith.constant 0 : i32
    %c0_i32_0 = arith.constant 0 : i32
    return %c0_i32, %arg1 : i32, i32
  }
  func.func @transform_3(%arg0: i32, %arg1: i32) -> (i32, i32) {
    %c0_i32 = arith.constant 0 : i32
    %c0_i32_0 = arith.constant 0 : i32
    return %arg1, %c0_i32 : i32, i32
  }
  func.func @transform_4(%arg0: i32, %arg1: i32) -> (i32, i32) {
    %c0_i32 = arith.constant 0 : i32
    %c0_i32_0 = arith.constant 0 : i32
    %c0_i32_1 = arith.constant 0 : i32
    return %c0_i32, %c0_i32_0 : i32, i32
  }
  func.func @transform_5(%arg0: i32, %arg1: i32) -> (i32, i32) {
    %c0_i32 = arith.constant 0 : i32
    %c0_i32_0 = arith.constant 0 : i32
    return %arg0, %c0_i32 : i32, i32
  }
}

</mosaic_0001>

<bundles_post_ra>
// kernel: tpu_custom_call.1
= control target key start
LH: loop header
LB: loop body
LE: loop exit
PB: predicated region body
PF: predicated region fallthrough
CT: control target
= control target key end

     0   :  { %s3337_s0 = inlined_call_operand.hbm [shape: bf16[512,128], index: 0, kind: input, shape index: {}]   ;;  %s3338_s1 = inlined_call_operand.hbm [shape: bf16[128,512], index: 1, kind: input, shape index: {}]   ;;  %s3339_s2 = inlined_call_operand.vmem [shape: f32[1,512], index: 2, kind: input, shape index: {}]   ;;  %s3340_s3 = inlined_call_operand.hbm [shape: bf16[512,128], index: 3, kind: input, shape index: {}]   ;;  %s3341_s4 = inlined_call_operand.vmem [shape: f32[1,128], index: 4, kind: input, shape index: {}]   ;;  %s3342_s5 = inlined_call_operand.hbm [shape: f32[512,128], index: 5, kind: output, shape index: {}]  }
   0x1   :  { %3355 = sst [smem:[#allocation21_spill]] %s3338_s1 }
   0x2   :  { %3356 = sst [smem:[#allocation22_spill]] %s3341_s4 }
   0x3   :  { %3357 = sst [smem:[#allocation23_spill]] %s3342_s5 }
   0x4   :  { %10 = vsyncpa [#allocation4], 0 }
   0x5   :  { %12 = vsyncpa [#allocation4 + $0x1], 0 }
   0x6   :  { %13 = vsyncpa [#allocation7], 0 }
   0x7   :  { %15 = vsyncpa [#allocation7 + $0x1], 0 }
   0x8   :  { %16 = vsyncpa [#allocation5], 0 }
   0x9   :  { %18 = vsyncpa [#allocation5 + $0x1], 0  ;;  %s2572_s18 = smov 0   ;;  %s2574_s19 = smov 0  }
   0xa   :  { %s2576_s20 = smov 0   ;;  %s2578_s21 = smov 0  }
   0xb   :  { %s2580_s22 = smov 0   ;;  %s2582_s23 = smov 0  }
   0xc   :  { %s2584_s24 = smov 0   ;;  %s2586_s25 = smov 0  }
   0xd   :  { %s2588_s26 = smov 0   ;;  %s2590_s27 = smov 0  }
   0xe   :  { %s2592_s28 = smov 0  }
   0xf LB: > { %3358 = sst [smem:[#allocation13_spill]] %s2495_s20  ;;  %s33_s29 = sadd.s32 1, %s2519_s26  ;;  %s2527_s28 = sphi %s2592_s28, %s24_s28   ;;  %s2523_s27 = sphi %s2590_s27, %s3396_s27   ;;  %s2519_s26 = sphi %s2588_s26, %s3402_s26   ;;  %s2515_s25 = sphi %s2586_s25, %s3394_s25   ;;  %s2511_s24 = sphi %s2584_s24, %s3401_s24   ;;  %s2507_s23 = sphi %s2582_s23, %s3393_s23   ;;  %s2503_s22 = sphi %s2580_s22, %s3400_s22   ;;  %s2499_s21 = sphi %s2578_s21, %s3399_s21   ;;  %s2495_s20 = sphi %s2576_s20, %s3391_s20   ;;  %s2491_s19 = sphi %s2574_s19, %s3398_s19   ;;  %s2487_s18 = sphi %s2572_s18, %s3397_s18  }
  0x10   : > { %3359 = sst [smem:[#allocation14_spill]] %s2507_s23  ;;  %p3345_p0 = scmp.eq.s32.totalorder %s2527_s28, 0 }
  0x11   : > { %3360 = sst [smem:[#allocation15_spill]] %s2515_s25  ;;  %p2629_p1 = scmp.ge.s32.totalorder %s33_s29, 2 }
  0x12   : > { %3361 = sst [smem:[#allocation16_spill]] %s2523_s27  ;;  %s69_s6 = sadd.s32 1, %s2495_s20 }
  0x13   : > { %p76_p2 = scmp.ne.s32.totalorder %s2495_s20, %s2491_s19  ;;  %s3404_s29 = smov (%p2629_p1, %s33_s29), 0 }
  0x14   : > { %3363 = sst [smem:[#allocation17_spill]] %s3404_s29  ;;  %s66_s7 = ssub.s32 %s2519_s26, %s3404_s29 }
  0x15   : > { %p78_p4 = por %p76_p2, %p3345_p0  ;;  %p3344_p5 = scmp.lt.s32.totalorder %s2527_s28, 4 }
  0x16   : > { %p67_p6 = scmp.eq.s32.totalorder %s66_s7, 0  ;;  %s229_s8 = sand.u32 1, %s2527_s28  }
  0x17   : > { %s231_s9 = sand.u32 1, %s2495_s20   ;;  %s1891_s12 = sshll.u32 %s2519_s26, 7 }
  0x18   : > { %s2650_s10 = scalar_select %p67_p6, %s2495_s20, %s69_s6  }
  0x19   : > { %s2652_s11 = sshll.u32 %s231_s9, 7  ;;  %s3365_s1 = sld [smem:[#allocation21_spill]] }
  0x1a   : > { %3364 = sst [smem:[#allocation18_spill]] %s2650_s10  ;;  %s233_s16 = scalar_lea.vmem [#allocation6], %s2652_s11 }
  0x1b   : > { %s240_s17 = sshll.u32 %s233_s16, 4  ;;  %p2663_p7 = pnand %p3344_p5, %p78_p4  ;;  %s2667_s17 = int_to_ptr.vmem [resolvable:$true] %s240_s17 }
  0x1c   : > { %s2670_s6 = scalar_lea.sflag [#allocation7], %s229_s8 }
  0x1d   : > { %p3346_p10 = pneg %p2663_p7 }
  0x1f   : > { %s2658_s15 = scalar_lea.hbm %s3365_s1, %s1891_s12  ;;  %s2316_s14 = scalar_lea.hbm %s3365_s1, 4096 }
  0x20   : > { %s2311_s9 = scalar_lea.hbm %s2658_s15, 2048  ;;  %p2317_p13 = scmp.lt.u32.totalorder %s2658_s15, %s3365_s1 }
  0x21   : > { %p2312_p9 = scmp.ne.s32.totalorder %s2658_s15, %s2311_s9  ;;  %p2318_p2 = scmp.lt.u32.totalorder %s2316_s14, %s2311_s9 }
  0x22   : > { %p2320_p6 = scmp.lt.u32.totalorder %s2311_s9, %s2658_s15 }
  0x23   : > { %p2314_p11 = pnand %p3346_p10, %p2312_p9  ;;  %p2319_p4 = por %p2318_p2, %p2317_p13 }
  0x25   : > { %p2315_p12 = pneg %p2314_p11  ;;  %p2321_p5 = por %p2320_p6, %p2319_p4 }
  0x27   : > { %p2322_p3 = pnand %p2321_p5, %p2315_p12 }
  0x29   : > { %2325 = shalt.err (!%p2322_p3)
}
  0x2a   : > { %s2326_s8 = scalar_lea.vmem %s2667_s17, 2048  ;;  %s2529_s12 = smov [#allocation6]  }
  0x2b   : > { %p2327_p9 = scmp.ne.s32.totalorder %s2667_s17, %s2326_s8  ;;  %s2331_s13 = sshll.u32 %s2529_s12, 4  ;;  %s2332_s13 = int_to_ptr.vmem [resolvable:$false] %s2331_s13 }
  0x2c   : > { %s2333_s29 = scalar_lea.vmem %s2332_s13, 4096  ;;  %p2334_p8 = scmp.lt.s32.totalorder %s2667_s17, %s2332_s13 }
  0x2d   : > { %p2329_p11 = pnand %p2327_p9, %p3346_p10  ;;  %p2335_p13 = scmp.lt.s32.totalorder %s2333_s29, %s2326_s8 }
  0x2f   : > { %p2330_p0 = pneg %p2329_p11  ;;  %p2336_p2 = por %p2335_p13, %p2334_p8 }
  0x31   : > { %p2337_p4 = pnand %p2336_p2, %p2330_p0 }
  0x33   : > { %2340 = shalt.err (!%p2337_p4)
}
  0x34   : > { %s2530_s9 = smov 256   ;;  %s2531_s14 = smov 128  }
  0x35   : > { %s2532_s16 = smov 8   ;;  %p277_p0 = scmp.lt.s32.totalorder %s2527_s28, 5 }
  0x36   : > { %2020 = dma.hbm_to_vmem [thread:$0]  (!%p2663_p7), %s2658_s15, 2048, %s2667_s17, %s2670_s6, %s2530_s9, %s2531_s14, %s2532_s16  }
  0x37   : > { %p3367_p3 = scmp.ge.s32.totalorder %s2527_s28, 1  ;;  %s2706_s12 = sadd.s32 4294967295, %s2527_s28  }
  0x38   : > { %s1816_s13 = sadd.s32 4294967294, %s2527_s28   ;;  %s36_s29 = sadd.s32 1, %s2523_s27 }
  0x39   : > { %p2701_p5 = pnand %p3367_p3, %p277_p0  ;;  %s43_s1 = sadd.s32 1, %s2507_s23 }
  0x3a   : > { %s3406_s29 = smov (!%p2629_p1, %s36_s29), %s2523_s27  ;;  %p50_p8 = scmp.ne.s32.totalorder %s2507_s23, %s2503_s22 }
  0x3b   : > { %s3368_s8 = scalar_select %p2701_p5, 1, 0 }
  0x3c   : > { %p56_p12 = scmp.ne.s32.totalorder %s2503_s22, %s2499_s21  ;;  %p38_p6 = scmp.ge.s32.totalorder %s3406_s29, 2 }
  0x3d   : > { %p57_p9 = scmp.eq.s32.totalorder %s2706_s12, 0  ;;  %p3369_p11 = scmp.eq.s32.totalorder %s2527_s28, 0 }
  0x3e   : > { %p179_p2 = scmp.eq.s32.totalorder %s2706_s12, 3  ;;  %s3408_s29 = smov (%p38_p6, %s3406_s29), 0 }
  0x3f   : > { %p2721_p13 = por %p3369_p11, %p50_p8  ;;  %3371 = sst [smem:[#allocation19_spill]] %s3408_s29 }
  0x40   : > { %p2731_p1 = por %p57_p9, %p56_p12  ;;  %p3373_p4 = scmp.ne.s32.totalorder %s2491_s19, %s2487_s18 }
  0x41   : > { %s40_s9 = ssub.s32 %s2523_s27, %s3408_s29  ;;  %p2744_p3 = por %p179_p2, %p50_p8 }
  0x42   : > { %s3372_s30 = scalar_select %p2731_p1, 1, 0 }
  0x43   : > { %p2738_p0 = por %p3373_p4, %p57_p9  ;;  %p41_p11 = scmp.eq.s32.totalorder %s40_s9, 0 }
  0x44   : > { %s3375_s14 = scalar_select %p2744_p3, 1, 0 }
  0x45   : > { %s3374_s17 = scalar_select %p2738_p0, 1, 0 }
  0x46   : > { %p185_p10 = scmp.eq.s32.totalorder %s1816_s13, 3  ;;  %s208_s16 = sand.u32 1, %s2507_s23  }
  0x47   : > { %s1890_s10 = sshll.u32 %s2523_s27, 11  ;;  %s1819_s18 = sshll.u32 %s208_s16, 7 }
  0x48   : > { %s2751_s20 = scalar_select %p41_p11, %s2507_s23, %s43_s1  }
  0x49   : > { %p2756_p6 = por %p185_p10, %p56_p12  ;;  %s2763_s29 = scalar_lea.hbm %s3337_s0, %s1890_s10 }
  0x4a   : > { %3376 = sst [smem:[#allocation20_spill]] %s2751_s20  ;;  %p3378_p8 = scmp.lt.s32.totalorder %s2527_s28, 4 }
  0x4b   : > { %s3377_s5 = scalar_select %p2756_p6, 1, 0 }
  0x4c   : > { %p2769_p9 = pnand %p3378_p8, %p2721_p13  ;;  %s212_s13 = scalar_lea.vmem [#allocation3], %s1819_s18 }
  0x4d   : > { %s219_s9 = sshll.u32 %s212_s13, 4  ;;  %s2775_s27 = scalar_lea.sflag [#allocation4], %s208_s16  ;;  %s2773_s9 = int_to_ptr.vmem [resolvable:$true] %s219_s9 }
  0x4e   : > { %s2341_s4 = scalar_lea.hbm %s2763_s29, 2048  ;;  %p2343_p12 = pneg %p2769_p9 }
  0x4f   : > { %p2342_p10 = scmp.ne.s32.totalorder %s2763_s29, %s2341_s4  ;;  %s2346_s15 = scalar_lea.hbm %s3337_s0, 4096 }
  0x50   : > { %p2347_p13 = scmp.lt.u32.totalorder %s2763_s29, %s3337_s0  ;;  %p2348_p11 = scmp.lt.u32.totalorder %s2346_s15, %s2341_s4 }
  0x51   : > { %p2344_p2 = pnand %p2343_p12, %p2342_p10  ;;  %p2350_p6 = scmp.lt.u32.totalorder %s2341_s4, %s2763_s29 }
  0x52   : > { %p2349_p8 = por %p2348_p11, %p2347_p13 }
  0x53   : > { %p2345_p4 = pneg %p2344_p2 }
  0x54   : > { %p2351_p3 = por %p2350_p6, %p2349_p8 }
  0x56   : > { %p2352_p0 = pnand %p2351_p3, %p2345_p4 }
  0x58   : > { %2355 = shalt.err (!%p2352_p0)
}
  0x59   : > { %s2356_s16 = scalar_lea.vmem %s2773_s9, 2048  ;;  %s2533_s18 = smov [#allocation3]  }
  0x5a   : > { %p2357_p10 = scmp.ne.s32.totalorder %s2773_s9, %s2356_s16  ;;  %s2361_s13 = sshll.u32 %s2533_s18, 4  ;;  %s2362_s13 = int_to_ptr.vmem [resolvable:$false] %s2361_s13 }
  0x5b   : > { %s2363_s20 = scalar_lea.vmem %s2362_s13, 4096  ;;  %p2364_p5 = scmp.lt.s32.totalorder %s2773_s9, %s2362_s13 }
  0x5c   : > { %p2359_p2 = pnand %p2357_p10, %p2343_p12  ;;  %p2365_p13 = scmp.lt.s32.totalorder %s2363_s20, %s2356_s16 }
  0x5e   : > { %p2360_p1 = pneg %p2359_p2  ;;  %p2366_p11 = por %p2365_p13, %p2364_p5 }
  0x60   : > { %p2367_p6 = pnand %p2366_p11, %p2360_p1 }
  0x62   : > { %2370 = shalt.err (!%p2367_p6)
}
  0x63   : > { %s2534_s23 = smov 64   ;;  %s2535_s4 = smov 4  }
  0x64   : > { %2017 = dma.hbm_to_vmem [thread:$0]  (!%p2769_p9), %s2763_s29, 2048, %s2773_s9, %s2775_s27, %s2534_s23, %s2534_s23, %s2535_s4  }
  0x65   : > { %s1892_s25 = sshll.u32 %s2519_s26, 11  ;;  %s262_s10 = scalar_lea.vmem [#allocation8], %s2652_s11 }
  0x66   : > { %s269_s15 = sshll.u32 %s262_s10, 4  ;;  %s2811_s13 = scalar_lea.hbm %s3340_s3, %s1892_s25  ;;  %s2813_s15 = int_to_ptr.vmem [resolvable:$true] %s269_s15 }
  0x67   : > { %s2371_s20 = scalar_lea.hbm %s2811_s13, 2048  ;;  %p3380_p1 = pneg %p2663_p7 }
  0x68   : > { %p2372_p5 = scmp.ne.s32.totalorder %s2811_s13, %s2371_s20  ;;  %s2376_s29 = scalar_lea.hbm %s3340_s3, 4096 }
  0x69   : > { %p2377_p9 = scmp.lt.u32.totalorder %s2811_s13, %s3340_s3  ;;  %p2378_p12 = scmp.lt.u32.totalorder %s2376_s29, %s2371_s20 }
  0x6a   : > { %p2374_p0 = pnand %p2372_p5, %p3380_p1  ;;  %p2380_p8 = scmp.lt.u32.totalorder %s2371_s20, %s2811_s13 }
  0x6b   : > { %p2379_p4 = por %p2378_p12, %p2377_p9 }
  0x6c   : > { %p2375_p3 = pneg %p2374_p0 }
  0x6d   : > { %p2381_p10 = por %p2380_p8, %p2379_p4 }
  0x6f   : > { %p2382_p2 = pnand %p2381_p10, %p2375_p3 }
  0x71   : > { %2385 = shalt.err (!%p2382_p2)
}
  0x72   : > { %s2386_s25 = scalar_lea.vmem %s2813_s15, 2048  ;;  %p3381_p11 = pmov %p3380_p1 }
  0x73   : > { %p2387_p13 = scmp.ne.s32.totalorder %s2813_s15, %s2386_s25  ;;  %s2536_s10 = smov [#allocation8]  }
  0x74   : > { %s2391_s16 = sshll.u32 %s2536_s10, 4  ;;  %s2392_s16 = int_to_ptr.vmem [resolvable:$false] %s2391_s16 }
  0x75   : > { %p2389_p6 = pnand %p2387_p13, %p3381_p11  ;;  %s2393_s18 = scalar_lea.vmem %s2392_s16, 4096 }
  0x76   : > { %p2394_p1 = scmp.lt.s32.totalorder %s2813_s15, %s2392_s16  ;;  %p2395_p0 = scmp.lt.s32.totalorder %s2393_s18, %s2386_s25 }
  0x77   : > { %p2390_p5 = pneg %p2389_p6 }
  0x78   : > { %p2396_p9 = por %p2395_p0, %p2394_p1 }
  0x7a   : > { %p2397_p12 = pnand %p2396_p9, %p2390_p5 }
  0x7c   : > { %2400 = shalt.err (!%p2397_p12)
}
  0x7d   : > { %2023 = dma.hbm_to_vmem [thread:$0]  (!%p2663_p7), %s2811_s13, 2048, %s2813_s15, %s2670_s6, %s2534_s23, %s2534_s23, %s2535_s4  }
  0x7e   : > { %p3382_p3 = scmp.ne.s32.totalorder %s3368_s8, 0 }
  0x7f   : > { %s2845_s20 = sand.u32 (!%p3382_p3), 1, %s2503_s22   ;;  %p3383_p4 = scmp.ne.s32.totalorder (!%p3382_p3), %s3372_s30, 0 }
  0x80   : > { %281 = sbr.rel (%p3382_p3) target bundleno = 809 (0x329), region = 40  ;;  %s1829_s27 = sshll.u32 (!%p3382_p3), %s2845_s20, 7 }
  0x81   : > { %s284_s11 = scalar_lea.sflag (!%p3382_p3), [#allocation4], %s2845_s20  ;;  %s2849_s29 = scalar_lea.vmem (!%p3382_p3), [#allocation3], %s1829_s27 }
  0x87   : > { %2474 = dma.done.wait (%p3383_p4), %s284_s11, 2048  }
  0x88   : > { %2476 = vsyncadd (%p3383_p4), %s284_s11, 4294965248  ;;  %s292_s7 = sand.u32 1, %s2706_s12   ;;  %s294_s6 = sand.u32 1, %s2491_s19  }
  0x89   : > { %s1830_s8 = sshll.u32 %s294_s6, 7  ;;  %s293_s23 = scalar_lea.sflag [#allocation7], %s292_s7 }
  0x8a   : > { %s2857_s4 = scalar_lea.vmem [#allocation6], %s1830_s8  ;;  %p3384_p7 = scmp.ne.s32.totalorder %s3374_s17, 0 }
  0x8c   : > { %2478 = dma.done.wait (%p3384_p7), %s293_s23, 4096  }
  0x8d   : > { %2480 = vsyncadd (%p3384_p7), %s293_s23, 4294963200  ;;  %s1832_s15 = sshll.u32 %s2845_s20, 8  ;;  %s1833_s13 = sshll.u32 %s2511_s24, 1 }
  0x8e   : > { %p349_p8 = scmp.lt.s32.totalorder %s1833_s13, 3  ;;  %s2871_s9 = scalar_lea.vmem [#allocation8], %s1830_s8 }
  0x8f   : > { %s2873_s25 = scalar_lea.vmem [#allocation9], %s1832_s15  ;;  %p1834_p10 = scmp.ne.s32.totalorder %s2511_s24, 0 }
  0x90   : > { %s3410_s13 = smov (!%p349_p8, %s1833_s13), 3  ;;  %v2537_v0 = vmov (!%p1834_p10), 0.0  }
  0x91   : > { %s351_s1 = scalar_lea.vmem %s3339_s2, %s3410_s13  ;;  %359 = sbr.rel (%p1834_p10) target bundleno = 161 (0xa1), region = 56  ;;  %360 = vst [vmem:[#allocation2] sm:$0xff] (!%p1834_p10), %v2537_v0  ;;  %361 = vst [vmem:[#allocation2 + $0x8] sm:$0xff] (!%p1834_p10), %v2537_v0 }
  0x92   : > { %362 = vst [vmem:[#allocation2 + $0x10] sm:$0xff] (!%p1834_p10), %v2537_v0  ;;  %363 = vst [vmem:[#allocation2 + $0x18] sm:$0xff] (!%p1834_p10), %v2537_v0 }
  0x93   : > { %364 = vst [vmem:[#allocation2 + $0x20] sm:$0xff] (!%p1834_p10), %v2537_v0  ;;  %365 = vst [vmem:[#allocation2 + $0x28] sm:$0xff] (!%p1834_p10), %v2537_v0 }
  0x94   : > { %366 = vst [vmem:[#allocation2 + $0x30] sm:$0xff] (!%p1834_p10), %v2537_v0  ;;  %367 = vst [vmem:[#allocation2 + $0x38] sm:$0xff] (!%p1834_p10), %v2537_v0 }
  0x95   : > { %368 = vst [vmem:[#allocation2 + $0x40] sm:$0xff] (!%p1834_p10), %v2537_v0  ;;  %369 = vst [vmem:[#allocation2 + $0x48] sm:$0xff] (!%p1834_p10), %v2537_v0 }
  0x96   : > { %370 = vst [vmem:[#allocation2 + $0x50] sm:$0xff] (!%p1834_p10), %v2537_v0  ;;  %371 = vst [vmem:[#allocation2 + $0x58] sm:$0xff] (!%p1834_p10), %v2537_v0 }
  0x97   : > { %372 = vst [vmem:[#allocation2 + $0x60] sm:$0xff] (!%p1834_p10), %v2537_v0  ;;  %373 = vst [vmem:[#allocation2 + $0x68] sm:$0xff] (!%p1834_p10), %v2537_v0 }
  0x98   : > { %374 = vst [vmem:[#allocation2 + $0x70] sm:$0xff] %v2537_v0  ;;  %375 = vst [vmem:[#allocation2 + $0x78] sm:$0xff] %v2537_v0 }
  0x99   : > { %376 = vst [vmem:[#allocation2 + $0x80] sm:$0xff] %v2537_v0  ;;  %377 = vst [vmem:[#allocation2 + $0x88] sm:$0xff] %v2537_v0 }
  0x9a   : > { %378 = vst [vmem:[#allocation2 + $0x90] sm:$0xff] %v2537_v0  ;;  %379 = vst [vmem:[#allocation2 + $0x98] sm:$0xff] %v2537_v0 }
  0x9b   : > { %380 = vst [vmem:[#allocation2 + $0xa0] sm:$0xff] %v2537_v0  ;;  %381 = vst [vmem:[#allocation2 + $0xa8] sm:$0xff] %v2537_v0 }
  0x9c   : > { %382 = vst [vmem:[#allocation2 + $0xb0] sm:$0xff] %v2537_v0  ;;  %383 = vst [vmem:[#allocation2 + $0xb8] sm:$0xff] %v2537_v0 }
  0x9d   : > { %384 = vst [vmem:[#allocation2 + $0xc0] sm:$0xff] %v2537_v0  ;;  %385 = vst [vmem:[#allocation2 + $0xc8] sm:$0xff] %v2537_v0 }
  0x9e   : > { %386 = vst [vmem:[#allocation2 + $0xd0] sm:$0xff] %v2537_v0  ;;  %387 = vst [vmem:[#allocation2 + $0xd8] sm:$0xff] %v2537_v0 }
  0x9f   : > { %388 = vst [vmem:[#allocation2 + $0xe0] sm:$0xff] %v2537_v0  ;;  %389 = vst [vmem:[#allocation2 + $0xe8] sm:$0xff] %v2537_v0 }
  0xa0   : > { %390 = vst [vmem:[#allocation2 + $0xf0] sm:$0xff] %v2537_v0  ;;  %391 = vst [vmem:[#allocation2 + $0xf8] sm:$0xff] %v2537_v0 }
  0xa1 PF: > { %v2127_v1 = vld [vmem:[%s2857_s4 + $0x4] ss:$8 sps:$4 sm:$0xff]   ;;  %v2129_v2 = vld [vmem:[%s2857_s4] ss:$8 sps:$4 sm:$0xff]   ;;  %v2538_v3 = vmov 0   ;;  %v2153_v24 = vld [vmem:[%s2849_s29 + $0x10] sm:$0xff]   ;;  %v442_v50 = vlaneseq }
  0xa2   : > { %660 = vmatprep.mubr.bf16.mxu0 %v2538_v3  ;;  %628 = vmatprep.subr.bf16.mxu0 %v2127_v1  ;;  %v2130_v4 = vld [vmem:[%s2857_s4 + $0x14] ss:$8 sps:$4 sm:$0xff]   ;;  %v2132_v5 = vld [vmem:[%s2857_s4 + $0x10] ss:$8 sps:$4 sm:$0xff]   ;;  %v2133_v6 = vld [vmem:[%s2857_s4 + $0x24] ss:$8 sps:$4 sm:$0xff]  }
  0xa3   : > { %629 = vmatpush1.bf16.msra.mxu0 %v2129_v2  ;;  %v2135_v7 = vld [vmem:[%s2857_s4 + $0x20] ss:$8 sps:$4 sm:$0xff]   ;;  %v2136_v8 = vld [vmem:[%s2857_s4 + $0x34] ss:$8 sps:$4 sm:$0xff]   ;;  %v2138_v9 = vld [vmem:[%s2857_s4 + $0x30] ss:$8 sps:$4 sm:$0xff]  }
  0xa4   : > { %630 = vmatprep.subr.bf16.mxu0 %v2130_v4  ;;  %v2139_v10 = vld [vmem:[%s2857_s4 + $0x44] ss:$8 sps:$4 sm:$0xff]   ;;  %v2141_v11 = vld [vmem:[%s2857_s4 + $0x40] ss:$8 sps:$4 sm:$0xff]   ;;  %v2142_v12 = vld [vmem:[%s2857_s4 + $0x54] ss:$8 sps:$4 sm:$0xff]  }
  0xa5   : > { %v2144_v13 = vld [vmem:[%s2857_s4 + $0x50] ss:$8 sps:$4 sm:$0xff]   ;;  %v2145_v14 = vld [vmem:[%s2857_s4 + $0x64] ss:$8 sps:$4 sm:$0xff]   ;;  %v2147_v15 = vld [vmem:[%s2857_s4 + $0x60] ss:$8 sps:$4 sm:$0xff]  }
  0xa6   : > { %v2148_v16 = vld [vmem:[%s2857_s4 + $0x74] ss:$8 sps:$4 sm:$0xff]   ;;  %v2150_v17 = vld [vmem:[%s2857_s4 + $0x70] ss:$8 sps:$4 sm:$0xff]   ;;  %v2167_v18 = vld [vmem:[%s2871_s9 + $0x40] sm:$0xff]   ;;  %v443_v51 = vshrl.u32 %v442_v50, 7 }
  0xa7   : > { %631 = vmatpush1.bf16.msra.mxu0 %v2132_v5  ;;  %v2168_v19 = vld [vmem:[%s2871_s9] sm:$0xff]   ;;  %1894 = vmatprep.subr.bf16.mxu1 %v2167_v18  ;;  %v2169_v20 = vld [vmem:[%s2871_s9 + $0x48] sm:$0xff]   ;;  %v2154_v25 = vld [vmem:[%s2849_s29 + $0x18] sm:$0xff]   ;;  %p1883_p2 = scmp.ne.s32.totalorder %s2511_s24, 1 }
  0xa8   : > { %632 = vmatprep.subr.bf16.mxu0 %v2133_v6  ;;  %v2151_v21 = vld [vmem:[%s2849_s29] sm:$0xff]   ;;  %1895 = vmatpush3.bf16.msra.mxu1 %v2168_v19  ;;  %v2170_v22 = vld [vmem:[%s2871_s9 + $0x8] sm:$0xff]   ;;  %v2157_v28 = vld [vmem:[%s2849_s29 + $0x30] sm:$0xff]   ;;  %v444_v52 = vsub.s32 0, %v443_v51  ;;  %v448_v54 = vsub.s32 1, %v443_v51  ;;  %s3385_s27 = sld [smem:[#allocation22_spill]] (!%p1883_p2) }
  0xa9   : > { %1896 = vmatprep.subr.bf16.mxu1 %v2169_v20  ;;  %v2152_v23 = vld [vmem:[%s2849_s29 + $0x8] sm:$0xff]   ;;  %v2155_v26 = vld [vmem:[%s2849_s29 + $0x20] sm:$0xff]   ;;  %v2158_v29 = vld [vmem:[%s2849_s29 + $0x38] sm:$0xff]  }
  0xaa   : > { %v2156_v27 = vld [vmem:[%s2849_s29 + $0x28] sm:$0xff]   ;;  %v2159_v30 = vld [vmem:[%s2849_s29 + $0x40] sm:$0xff]   ;;  %v2161_v32 = vld [vmem:[%s2849_s29 + $0x50] sm:$0xff]  }
  0xab   : > { %633 = vmatpush1.bf16.msra.mxu0 %v2135_v7  ;;  %v2160_v31 = vld [vmem:[%s2849_s29 + $0x48] sm:$0xff]   ;;  %v2171_v33 = vld [vmem:[%s2871_s9 + $0x50] sm:$0xff]   ;;  %v2162_v34 = vld [vmem:[%s2849_s29 + $0x58] sm:$0xff]  }
  0xac   : > { %634 = vmatprep.subr.bf16.mxu0 %v2136_v8  ;;  %1897 = vmatpush3.bf16.msra.mxu1 %v2170_v22  ;;  %v2172_v35 = vld [vmem:[%s2871_s9 + $0x10] sm:$0xff]   ;;  %v2173_v36 = vld [vmem:[%s2871_s9 + $0x58] sm:$0xff]   ;;  %v2175_v38 = vld [vmem:[%s2871_s9 + $0x60] sm:$0xff]  }
  0xad   : > { %1898 = vmatprep.subr.bf16.mxu1 %v2171_v33  ;;  %v2174_v37 = vld [vmem:[%s2871_s9 + $0x18] sm:$0xff]   ;;  %v2163_v39 = vld [vmem:[%s2849_s29 + $0x60] sm:$0xff]   ;;  %v2177_v41 = vld [vmem:[%s2871_s9 + $0x68] sm:$0xff]  }
  0xae   : > { %v2176_v40 = vld [vmem:[%s2871_s9 + $0x20] sm:$0xff]   ;;  %v2178_v42 = vld [vmem:[%s2871_s9 + $0x28] sm:$0xff]   ;;  %v2179_v43 = vld [vmem:[%s2871_s9 + $0x70] sm:$0xff]  }
  0xaf   : > { %635 = vmatpush1.bf16.msra.mxu0 %v2138_v9  ;;  %v2164_v44 = vld [vmem:[%s2849_s29 + $0x68] sm:$0xff]   ;;  %v2180_v45 = vld [vmem:[%s2871_s9 + $0x30] sm:$0xff]   ;;  %v2181_v46 = vld [vmem:[%s2871_s9 + $0x78] sm:$0xff]  }
  0xb0   : > { %636 = vmatprep.subr.bf16.mxu0 %v2139_v10  ;;  %1899 = vmatpush3.bf16.msra.mxu1 %v2172_v35  ;;  %v2182_v47 = vld [vmem:[%s2871_s9 + $0x38] sm:$0xff]   ;;  %v2165_v48 = vld [vmem:[%s2849_s29 + $0x70] sm:$0xff]   ;;  %v440_v53 = vld [vmem:[%s351_s1] sm:$0x3] }
  0xb1   : > { %1900 = vmatprep.subr.bf16.mxu1 %v2173_v36  ;;  %v2166_v49 = vld [vmem:[%s2849_s29 + $0x78] sm:$0xff]   ;;  %v2945_v55 = vrot.slane %v440_v53, %v444_v52  ;;  %v2947_v56 = vrot.slane %v440_v53, %v448_v54 }
  0xb3   : > { %637 = vmatpush1.bf16.msra.mxu0 %v2141_v11 }
  0xb4   : > { %638 = vmatprep.subr.bf16.mxu0 %v2142_v12  ;;  %1901 = vmatpush3.bf16.msra.mxu1 %v2174_v37 }
  0xb5   : > { %1902 = vmatprep.subr.bf16.mxu1 %v2175_v38 }
  0xb7   : > { %639 = vmatpush1.bf16.msra.mxu0 %v2144_v13 }
  0xb8   : > { %640 = vmatprep.subr.bf16.mxu0 %v2145_v14  ;;  %1903 = vmatpush3.bf16.msra.mxu1 %v2176_v40 }
  0xb9   : > { %1904 = vmatprep.subr.bf16.mxu1 %v2177_v41 }
  0xbb   : > { %641 = vmatpush1.bf16.msra.mxu0 %v2147_v15 }
  0xbc   : > { %642 = vmatprep.subr.bf16.mxu0 %v2148_v16  ;;  %1905 = vmatpush3.bf16.msra.mxu1 %v2178_v42 }
  0xbd   : > { %1906 = vmatprep.subr.bf16.mxu1 %v2179_v43 }
  0xbf   : > { %643 = vmatpush1.bf16.msra.mxu0 %v2150_v17 }
  0xc0   : > { %1907 = vmatpush3.bf16.msra.mxu1 %v2180_v45 }
  0xc1   : > { %1908 = vmatprep.subr.bf16.mxu1 %v2181_v46 }
  0xc2   : > { %661 = vmatmul.mubr.bf16.vlgmr.msra.gmra.mrb[0].mxu0 %v2151_v21 }
  0xc3   : > { %670 = vmatprep.mubr.bf16.mxu0 %v2538_v3 }
  0xc4   : > { %1909 = vmatpush3.bf16.msra.mxu1 %v2182_v47 }
  0xca   : > { %671 = vmatmul.mubr.bf16.gmra.mrb[4].mxu0 %v2152_v23 }
  0xcb   : > { %680 = vmatprep.mubr.bf16.mxu0 %v2538_v3 }
  0xd2   : > { %681 = vmatmul.mubr.bf16.gmra.mrb[8].mxu0 %v2153_v24 }
  0xd3   : > { %690 = vmatprep.mubr.bf16.mxu0 %v2538_v3 }
  0xda   : > { %691 = vmatmul.mubr.bf16.gmra.mrb[12].mxu0 %v2154_v25 }
  0xdb   : > { %700 = vmatprep.mubr.bf16.mxu0 %v2538_v3 }
  0xe2   : > { %701 = vmatmul.mubr.bf16.gmra.mrb[16].mxu0 %v2155_v26 }
  0xe3   : > { %710 = vmatprep.mubr.bf16.mxu0 %v2538_v3 }
  0xea   : > { %711 = vmatmul.mubr.bf16.gmra.mrb[20].mxu0 %v2156_v27 }
  0xeb   : > { %720 = vmatprep.mubr.bf16.mxu0 %v2538_v3 }
  0xf2   : > { %721 = vmatmul.mubr.bf16.gmra.mrb[24].mxu0 %v2157_v28 }
  0xf3   : > { %730 = vmatprep.mubr.bf16.mxu0 %v2538_v3 }
  0xfa   : > { %731 = vmatmul.mubr.bf16.gmra.mrb[28].mxu0 %v2158_v29 }
  0xfb   : > { %740 = vmatprep.mubr.bf16.mxu0 %v2538_v3 }
 0x102   : > { %741 = vmatmul.mubr.bf16.gmra.mrb[32].mxu0 %v2159_v30 }
 0x103   : > { %750 = vmatprep.mubr.bf16.mxu0 %v2538_v3 }
 0x10a   : > { %751 = vmatmul.mubr.bf16.gmra.mrb[36].mxu0 %v2160_v31 }
 0x10b   : > { %760 = vmatprep.mubr.bf16.mxu0 %v2538_v3 }
 0x112   : > { %761 = vmatmul.mubr.bf16.gmra.mrb[40].mxu0 %v2161_v32 }
 0x113   : > { %770 = vmatprep.mubr.bf16.mxu0 %v2538_v3 }
 0x11a   : > { %771 = vmatmul.mubr.bf16.gmra.mrb[44].mxu0 %v2162_v34 }
 0x11b   : > { %780 = vmatprep.mubr.bf16.mxu0 %v2538_v3 }
 0x122   : > { %781 = vmatmul.mubr.bf16.gmra.mrb[48].mxu0 %v2163_v39 }
 0x123   : > { %790 = vmatprep.mubr.bf16.mxu0 %v2538_v3 }
 0x12a   : > { %791 = vmatmul.mubr.bf16.gmra.mrb[52].mxu0 %v2164_v44 }
 0x12b   : > { %800 = vmatprep.mubr.bf16.mxu0 %v2538_v3 }
 0x132   : > { %801 = vmatmul.mubr.bf16.gmra.mrb[56].mxu0 %v2165_v48 }
 0x133   : > { %810 = vmatprep.mubr.bf16.mxu0 %v2538_v3 }
 0x13a   : > { %811 = vmatmul.mubr.bf16.gmra.mrb[60].mxu0 %v2166_v49 }
 0x195   : > { %v662_v57 = vpop.f32.mrb[0].mxu0 }
 0x196   : > { %v663_v58 = vadd.f32 %v662_v57, %v2945_v55  ;;  %v664_v59 = vpop.f32.mrb[1].mxu0 }
 0x197   : > { %v665_v60 = vadd.f32 %v664_v59, %v2947_v56  ;;  %v666_v61 = vpop.f32.mrb[2].mxu0 }
 0x198   : > { %v885_v62 = vmul.f32 0.70710677, %v663_v58  ;;  %v667_v63 = vadd.f32 %v666_v61, %v2945_v55  ;;  %v668_v0 = vpop.f32.mrb[3].mxu0  ;;  %v821_v21 = vmul.f32 0.5, %v663_v58 }
 0x199   : > { %v886_v1 = vmul.f32 0.70710677, %v665_v60  ;;  %v669_v2 = vadd.f32 %v668_v0, %v2947_v56  ;;  %v822_v31 = vmul.f32 0.5, %v665_v60 }
 0x19a   : > { %2183 = verf.f32 %v885_v62  ;;  %v887_v3 = vmul.f32 0.70710677, %v667_v63  ;;  %v823_v26 = vmul.f32 0.5, %v667_v63 }
 0x19b   : > { %2185 = verf.f32 %v886_v1  ;;  %v888_v4 = vmul.f32 0.70710677, %v669_v2  ;;  %v824_v37 = vmul.f32 0.5, %v669_v2 }
 0x19c   : > { %2187 = verf.f32 %v887_v3 }
 0x19d   : > { %2189 = verf.f32 %v888_v4  ;;  %v672_v5 = vpop.f32.mrb[4].mxu0 }
 0x19e   : > { %v673_v6 = vadd.f32 %v672_v5, %v2945_v55  ;;  %v674_v7 = vpop.f32.mrb[5].mxu0 }
 0x19f   : > { %v675_v8 = vadd.f32 %v674_v7, %v2947_v56  ;;  %v676_v9 = vpop.f32.mrb[6].mxu0 }
 0x1a0   : > { %v889_v10 = vmul.f32 0.70710677, %v673_v6  ;;  %v677_v11 = vadd.f32 %v676_v9, %v2945_v55  ;;  %v678_v12 = vpop.f32.mrb[7].mxu0  ;;  %v825_v58 = vmul.f32 0.5, %v673_v6 }
 0x1a1   : > { %v890_v13 = vmul.f32 0.70710677, %v675_v8  ;;  %v679_v14 = vadd.f32 %v678_v12, %v2947_v56  ;;  %v826_v63 = vmul.f32 0.5, %v675_v8 }
 0x1a2   : > { %2191 = verf.f32 %v889_v10  ;;  %v891_v15 = vmul.f32 0.70710677, %v677_v11  ;;  %v827_v59 = vmul.f32 0.5, %v677_v11 }
 0x1a3   : > { %2193 = verf.f32 %v890_v13  ;;  %v892_v16 = vmul.f32 0.70710677, %v679_v14  ;;  %v828_v0 = vmul.f32 0.5, %v679_v14 }
 0x1a4   : > { %v2184_v17 = vpop.eup %2183  ;;  %2195 = verf.f32 %v891_v15 }
 0x1a5   : > { %v2186_v18 = vpop.eup %2185  ;;  %2197 = verf.f32 %v892_v16  ;;  %v682_v19 = vpop.f32.mrb[8].mxu0  ;;  %v1013_v22 = vadd.f32 1.0, %v2184_v17 }
 0x1a6   : > { %v2188_v20 = vpop.eup %2187  ;;  %v2958_v23 = vadd.f32 %v682_v19, %v2945_v55  ;;  %v684_v24 = vpop.f32.mrb[9].mxu0  ;;  %v1014_v30 = vadd.f32 1.0, %v2186_v18 }
 0x1a7   : > { %v2190_v25 = vpop.eup %2189  ;;  %v1015_v27 = vadd.f32 1.0, %v2188_v20  ;;  %v2961_v28 = vadd.f32 %v684_v24, %v2947_v56  ;;  %v686_v29 = vpop.f32.mrb[10].mxu0  ;;  %v1077_v40 = vmul.f32 %v1013_v22, %v821_v21 }
 0x1a8   : > { %v893_v32 = vmul.f32 0.70710677, %v2958_v23  ;;  %v2965_v33 = vadd.f32 %v686_v29, %v2945_v55  ;;  %v688_v34 = vpop.f32.mrb[11].mxu0  ;;  %v1016_v35 = vadd.f32 1.0, %v2190_v25  ;;  %v1078_v43 = vmul.f32 %v1014_v30, %v822_v31 }
 0x1a9   : > { %v1079_v36 = vmul.f32 %v1015_v27, %v823_v26  ;;  %v894_v38 = vmul.f32 0.70710677, %v2961_v28  ;;  %v2969_v39 = vadd.f32 %v688_v34, %v2947_v56  ;;  %v829_v25 = vmul.f32 0.5, %v2958_v23 }
 0x1aa   : > { %2199 = verf.f32 %v893_v32  ;;  %v895_v41 = vmul.f32 0.70710677, %v2965_v33  ;;  %v1080_v44 = vmul.f32 %v1016_v35, %v824_v37  ;;  %v831_v26 = vmul.f32 0.5, %v2965_v33 }
 0x1ab   : > { %2201 = verf.f32 %v894_v38  ;;  %v896_v42 = vmul.f32 0.70710677, %v2969_v39  ;;  %v1173_v46 = vpack.c.bf16 %v1079_v36, %v1077_v40  ;;  %v830_v31 = vmul.f32 0.5, %v2961_v28 }
 0x1ac   : > { %v2192_v45 = vpop.eup %2191  ;;  %2203 = verf.f32 %v895_v41  ;;  %v1174_v50 = vpack.c.bf16 %v1080_v44, %v1078_v43  ;;  %v832_v32 = vmul.f32 0.5, %v2969_v39 }
 0x1ad   : > { %v2194_v47 = vpop.eup %2193  ;;  %v1017_v48 = vadd.f32 1.0, %v2192_v45  ;;  %2205 = verf.f32 %v896_v42  ;;  %v692_v49 = vpop.f32.mrb[12].mxu0 }
 0x1ae   : > { %v2196_v51 = vpop.eup %2195  ;;  %v1018_v52 = vadd.f32 1.0, %v2194_v47  ;;  %v2974_v53 = vadd.f32 %v692_v49, %v2945_v55  ;;  %v694_v54 = vpop.f32.mrb[13].mxu0  ;;  %1365 = vmatprep.mubr.bf16.mxu1 %v1174_v50 }
 0x1af   : > { %v2198_v57 = vpop.eup %2197  ;;  %v1019_v60 = vadd.f32 1.0, %v2196_v51  ;;  %v2977_v61 = vadd.f32 %v694_v54, %v2947_v56  ;;  %v696_v62 = vpop.f32.mrb[14].mxu0  ;;  %1366 = vmatmul.mubr.bf16.vlgmr.msra.gmra.mrb[0].mxu1 %v1173_v46  ;;  %v1081_v4 = vmul.f32 %v1017_v48, %v825_v58 }
 0x1b0   : > { %v1020_v1 = vadd.f32 1.0, %v2198_v57  ;;  %v897_v2 = vmul.f32 0.70710677, %v2974_v53  ;;  %v698_v3 = vpop.f32.mrb[15].mxu0  ;;  %v697_v6 = vadd.f32 %v696_v62, %v2945_v55  ;;  %v1082_v9 = vmul.f32 %v1018_v52, %v826_v63 }
 0x1b1   : > { %v1083_v5 = vmul.f32 %v1019_v60, %v827_v59  ;;  %v898_v7 = vmul.f32 0.70710677, %v2977_v61  ;;  %v699_v11 = vadd.f32 %v698_v3, %v2947_v56  ;;  %v833_v52 = vmul.f32 0.5, %v2974_v53 }
 0x1b2   : > { %v1084_v10 = vmul.f32 %v1020_v1, %v828_v0  ;;  %2207 = verf.f32 %v897_v2  ;;  %v899_v12 = vmul.f32 0.70710677, %v697_v6  ;;  %v834_v60 = vmul.f32 0.5, %v2977_v61 }
 0x1b3   : > { %2209 = verf.f32 %v898_v7  ;;  %v1175_v8 = vpack.c.bf16 %v1083_v5, %v1081_v4  ;;  %v900_v14 = vmul.f32 0.70710677, %v699_v11  ;;  %v835_v62 = vmul.f32 0.5, %v697_v6 }
 0x1b4   : > { %v2200_v13 = vpop.eup %2199  ;;  %v1176_v15 = vpack.c.bf16 %v1084_v10, %v1082_v9  ;;  %2211 = verf.f32 %v899_v12  ;;  %v836_v2 = vmul.f32 0.5, %v699_v11 }
 0x1b5   : > { %v2202_v16 = vpop.eup %2201  ;;  %v1021_v17 = vadd.f32 1.0, %v2200_v13  ;;  %v702_v18 = vpop.f32.mrb[16].mxu0  ;;  %2213 = verf.f32 %v900_v14 }
 0x1b6   : > { %v2204_v19 = vpop.eup %2203  ;;  %v1022_v20 = vadd.f32 1.0, %v2202_v16  ;;  %v2984_v21 = vadd.f32 %v702_v18, %v2945_v55  ;;  %v704_v22 = vpop.f32.mrb[17].mxu0  ;;  %1373 = vmatprep.mubr.bf16.mxu1 %v1176_v15 }
 0x1b7   : > { %v2206_v24 = vpop.eup %2205  ;;  %v1023_v27 = vadd.f32 1.0, %v2204_v19  ;;  %v2989_v29 = vadd.f32 %v704_v22, %v2947_v56  ;;  %v706_v30 = vpop.f32.mrb[18].mxu0  ;;  %1374 = vmatmul.mubr.bf16.gmra.mrb[4].mxu1 %v1175_v8  ;;  %v1085_v37 = vmul.f32 %v1021_v17, %v829_v25 }
 0x1b8   : > { %v1024_v34 = vadd.f32 1.0, %v2206_v24  ;;  %v901_v35 = vmul.f32 0.70710677, %v2984_v21  ;;  %v708_v36 = vpop.f32.mrb[19].mxu0  ;;  %v707_v33 = vadd.f32 %v706_v30, %v2945_v55  ;;  %v1086_v40 = vmul.f32 %v1022_v20, %v830_v31 }
 0x1b9   : > { %v1087_v38 = vmul.f32 %v1023_v27, %v831_v26  ;;  %v902_v23 = vmul.f32 0.70710677, %v2989_v29  ;;  %v709_v42 = vadd.f32 %v708_v36, %v2947_v56  ;;  %v837_v20 = vmul.f32 0.5, %v2984_v21 }
 0x1ba   : > { %v1088_v41 = vmul.f32 %v1024_v34, %v832_v32  ;;  %2215 = verf.f32 %v901_v35  ;;  %v903_v28 = vmul.f32 0.70710677, %v707_v33  ;;  %v838_v27 = vmul.f32 0.5, %v2989_v29 }
 0x1bb   : > { %2217 = verf.f32 %v902_v23  ;;  %v1177_v43 = vpack.c.bf16 %v1087_v38, %v1085_v37  ;;  %v904_v44 = vmul.f32 0.70710677, %v709_v42  ;;  %v839_v30 = vmul.f32 0.5, %v707_v33 }
 0x1bc   : > { %v2208_v39 = vpop.eup %2207  ;;  %v1178_v45 = vpack.c.bf16 %v1088_v41, %v1086_v40  ;;  %2219 = verf.f32 %v903_v28  ;;  %v840_v35 = vmul.f32 0.5, %v709_v42 }
 0x1bd   : > { %v2210_v46 = vpop.eup %2209  ;;  %v712_v47 = vpop.f32.mrb[20].mxu0  ;;  %v1025_v48 = vadd.f32 1.0, %v2208_v39  ;;  %2221 = verf.f32 %v904_v44 }
 0x1be   : > { %v2998_v49 = vadd.f32 %v712_v47, %v2945_v55  ;;  %v714_v50 = vpop.f32.mrb[21].mxu0  ;;  %1381 = vmatprep.mubr.bf16.mxu1 %v1178_v45  ;;  %v2212_v51 = vpop.eup %2211  ;;  %v1026_v54 = vadd.f32 1.0, %v2210_v46 }
 0x1bf   : > { %v3002_v57 = vadd.f32 %v714_v50, %v2947_v56  ;;  %v716_v58 = vpop.f32.mrb[22].mxu0  ;;  %v2214_v59 = vpop.eup %2213  ;;  %v1027_v63 = vadd.f32 1.0, %v2212_v51  ;;  %1382 = vmatmul.mubr.bf16.gmra.mrb[8].mxu1 %v1177_v43  ;;  %v1089_v5 = vmul.f32 %v1025_v48, %v833_v52 }
 0x1c0   : > { %v905_v0 = vmul.f32 0.70710677, %v2998_v49  ;;  %v718_v1 = vpop.f32.mrb[23].mxu0  ;;  %v1028_v3 = vadd.f32 1.0, %v2214_v59  ;;  %v3008_v53 = vadd.f32 %v716_v58, %v2945_v55  ;;  %v1090_v61 = vmul.f32 %v1026_v54, %v834_v60 }
 0x1c1   : > { %v906_v4 = vmul.f32 0.70710677, %v3002_v57  ;;  %v1091_v7 = vmul.f32 %v1027_v63, %v835_v62  ;;  %v3011_v9 = vadd.f32 %v718_v1, %v2947_v56  ;;  %v841_v51 = vmul.f32 0.5, %v2998_v49 }
 0x1c2   : > { %2223 = verf.f32 %v905_v0  ;;  %v1092_v6 = vmul.f32 %v1028_v3, %v836_v2  ;;  %v907_v10 = vmul.f32 0.70710677, %v3008_v53  ;;  %v842_v60 = vmul.f32 0.5, %v3002_v57 }
 0x1c3   : > { %2225 = verf.f32 %v906_v4  ;;  %v908_v11 = vmul.f32 0.70710677, %v3011_v9  ;;  %v1179_v8 = vpack.c.bf16 %v1091_v7, %v1089_v5  ;;  %v843_v62 = vmul.f32 0.5, %v3008_v53 }
 0x1c4   : > { %v2216_v12 = vpop.eup %2215  ;;  %2227 = verf.f32 %v907_v10  ;;  %v1180_v15 = vpack.c.bf16 %v1092_v6, %v1090_v61  ;;  %v844_v2 = vmul.f32 0.5, %v3011_v9 }
 0x1c5   : > { %v2218_v13 = vpop.eup %2217  ;;  %v722_v14 = vpop.f32.mrb[24].mxu0  ;;  %v1029_v16 = vadd.f32 1.0, %v2216_v12  ;;  %2229 = verf.f32 %v908_v11 }
 0x1c6   : > { %v3016_v17 = vadd.f32 %v722_v14, %v2945_v55  ;;  %v724_v18 = vpop.f32.mrb[25].mxu0  ;;  %v2220_v19 = vpop.eup %2219  ;;  %v1030_v22 = vadd.f32 1.0, %v2218_v13  ;;  %1389 = vmatprep.mubr.bf16.mxu1 %v1180_v15 }
 0x1c7   : > { %v3020_v24 = vadd.f32 %v724_v18, %v2947_v56  ;;  %v726_v25 = vpop.f32.mrb[26].mxu0  ;;  %v2222_v26 = vpop.eup %2221  ;;  %v1031_v31 = vadd.f32 1.0, %v2220_v19  ;;  %1390 = vmatmul.mubr.bf16.gmra.mrb[12].mxu1 %v1179_v8  ;;  %v1093_v38 = vmul.f32 %v1029_v16, %v837_v20 }
 0x1c8   : > { %v909_v32 = vmul.f32 0.70710677, %v3016_v17  ;;  %v728_v34 = vpop.f32.mrb[27].mxu0  ;;  %v1032_v36 = vadd.f32 1.0, %v2222_v26  ;;  %v3026_v21 = vadd.f32 %v726_v25, %v2945_v55  ;;  %v1094_v29 = vmul.f32 %v1030_v22, %v838_v27 }
 0x1c9   : > { %v910_v37 = vmul.f32 0.70710677, %v3020_v24  ;;  %v1095_v23 = vmul.f32 %v1031_v31, %v839_v30  ;;  %v3029_v40 = vadd.f32 %v728_v34, %v2947_v56  ;;  %v845_v19 = vmul.f32 0.5, %v3016_v17 }
 0x1ca   : > { %2231 = verf.f32 %v909_v32  ;;  %v1096_v33 = vmul.f32 %v1032_v36, %v840_v35  ;;  %v911_v41 = vmul.f32 0.70710677, %v3026_v21  ;;  %v846_v27 = vmul.f32 0.5, %v3020_v24 }
 0x1cb   : > { %2233 = verf.f32 %v910_v37  ;;  %v912_v42 = vmul.f32 0.70710677, %v3029_v40  ;;  %v1181_v43 = vpack.c.bf16 %v1095_v23, %v1093_v38  ;;  %v847_v30 = vmul.f32 0.5, %v3026_v21 }
 0x1cc   : > { %v2224_v28 = vpop.eup %2223  ;;  %2235 = verf.f32 %v911_v41  ;;  %v1182_v45 = vpack.c.bf16 %v1096_v33, %v1094_v29  ;;  %v848_v35 = vmul.f32 0.5, %v3029_v40 }
 0x1cd   : > { %v2226_v39 = vpop.eup %2225  ;;  %v732_v44 = vpop.f32.mrb[28].mxu0  ;;  %v1033_v46 = vadd.f32 1.0, %v2224_v28  ;;  %2237 = verf.f32 %v912_v42 }
 0x1ce   : > { %v3034_v47 = vadd.f32 %v732_v44, %v2945_v55  ;;  %v734_v48 = vpop.f32.mrb[29].mxu0  ;;  %v2228_v50 = vpop.eup %2227  ;;  %v1034_v52 = vadd.f32 1.0, %v2226_v39  ;;  %1397 = vmatprep.mubr.bf16.mxu1 %v1182_v45 }
 0x1cf   : > { %v3038_v54 = vadd.f32 %v734_v48, %v2947_v56  ;;  %v736_v58 = vpop.f32.mrb[30].mxu0  ;;  %v2230_v59 = vpop.eup %2229  ;;  %v1035_v63 = vadd.f32 1.0, %v2228_v50  ;;  %1398 = vmatmul.mubr.bf16.gmra.mrb[16].mxu1 %v1181_v43  ;;  %v1097_v5 = vmul.f32 %v1033_v46, %v841_v51 }
 0x1d0   : > { %v913_v0 = vmul.f32 0.70710677, %v3034_v47  ;;  %v738_v1 = vpop.f32.mrb[31].mxu0  ;;  %v1036_v3 = vadd.f32 1.0, %v2230_v59  ;;  %v3046_v4 = vadd.f32 %v736_v58, %v2945_v55  ;;  %v1098_v53 = vmul.f32 %v1034_v52, %v842_v60 }
 0x1d1   : > { %v914_v49 = vmul.f32 0.70710677, %v3038_v54  ;;  %v1099_v7 = vmul.f32 %v1035_v63, %v843_v62  ;;  %v3049_v57 = vadd.f32 %v738_v1, %v2947_v56  ;;  %v849_v50 = vmul.f32 0.5, %v3034_v47 }
 0x1d2   : > { %2239 = verf.f32 %v913_v0  ;;  %v1100_v61 = vmul.f32 %v1036_v3, %v844_v2  ;;  %v915_v6 = vmul.f32 0.70710677, %v3046_v4  ;;  %v850_v60 = vmul.f32 0.5, %v3038_v54 }
 0x1d3   : > { %2241 = verf.f32 %v914_v49  ;;  %v916_v9 = vmul.f32 0.70710677, %v3049_v57  ;;  %v1183_v12 = vpack.c.bf16 %v1099_v7, %v1097_v5  ;;  %v851_v62 = vmul.f32 0.5, %v3046_v4 }
 0x1d4   : > { %v2232_v10 = vpop.eup %2231  ;;  %2243 = verf.f32 %v915_v6  ;;  %v1184_v13 = vpack.c.bf16 %v1100_v61, %v1098_v53  ;;  %v852_v2 = vmul.f32 0.5, %v3049_v57 }
 0x1d5   : > { %v2234_v11 = vpop.eup %2233  ;;  %v742_v8 = vpop.f32.mrb[32].mxu0  ;;  %v1037_v14 = vadd.f32 1.0, %v2232_v10  ;;  %2245 = verf.f32 %v916_v9 }
 0x1d6   : > { %v3054_v15 = vadd.f32 %v742_v8, %v2945_v55  ;;  %v744_v16 = vpop.f32.mrb[33].mxu0  ;;  %v2236_v18 = vpop.eup %2235  ;;  %v1038_v20 = vadd.f32 1.0, %v2234_v11  ;;  %1405 = vmatprep.mubr.bf16.mxu1 %v1184_v13 }
 0x1d7   : > { %v3058_v22 = vadd.f32 %v744_v16, %v2947_v56  ;;  %v746_v25 = vpop.f32.mrb[34].mxu0  ;;  %v2238_v26 = vpop.eup %2237  ;;  %v1039_v31 = vadd.f32 1.0, %v2236_v18  ;;  %1406 = vmatmul.mubr.bf16.gmra.mrb[20].mxu1 %v1183_v12  ;;  %v1101_v38 = vmul.f32 %v1037_v14, %v845_v19 }
 0x1d8   : > { %v917_v32 = vmul.f32 0.70710677, %v3054_v15  ;;  %v748_v34 = vpop.f32.mrb[35].mxu0  ;;  %v1040_v36 = vadd.f32 1.0, %v2238_v26  ;;  %v3066_v37 = vadd.f32 %v746_v25, %v2945_v55  ;;  %v1102_v21 = vmul.f32 %v1038_v20, %v846_v27 }
 0x1d9   : > { %v918_v17 = vmul.f32 0.70710677, %v3058_v22  ;;  %v1103_v23 = vmul.f32 %v1039_v31, %v847_v30  ;;  %v3069_v24 = vadd.f32 %v748_v34, %v2947_v56  ;;  %v853_v18 = vmul.f32 0.5, %v3054_v15 }
 0x1da   : > { %2247 = verf.f32 %v917_v32  ;;  %v1104_v29 = vmul.f32 %v1040_v36, %v848_v35  ;;  %v919_v33 = vmul.f32 0.70710677, %v3066_v37  ;;  %v854_v27 = vmul.f32 0.5, %v3058_v22 }
 0x1db   : > { %2249 = verf.f32 %v918_v17  ;;  %v920_v40 = vmul.f32 0.70710677, %v3069_v24  ;;  %v1185_v28 = vpack.c.bf16 %v1103_v23, %v1101_v38  ;;  %v855_v30 = vmul.f32 0.5, %v3066_v37 }
 0x1dc   : > { %v2240_v41 = vpop.eup %2239  ;;  %2251 = verf.f32 %v919_v33  ;;  %v1186_v39 = vpack.c.bf16 %v1104_v29, %v1102_v21  ;;  %v856_v35 = vmul.f32 0.5, %v3069_v24 }
 0x1dd   : > { %v2242_v42 = vpop.eup %2241  ;;  %v752_v43 = vpop.f32.mrb[36].mxu0  ;;  %v1041_v44 = vadd.f32 1.0, %v2240_v41  ;;  %2253 = verf.f32 %v920_v40 }
 0x1de   : > { %v3074_v45 = vadd.f32 %v752_v43, %v2945_v55  ;;  %v754_v46 = vpop.f32.mrb[37].mxu0  ;;  %v2244_v48 = vpop.eup %2243  ;;  %v1042_v51 = vadd.f32 1.0, %v2242_v42  ;;  %1413 = vmatprep.mubr.bf16.mxu1 %v1186_v39 }
 0x1df   : > { %v3078_v52 = vadd.f32 %v754_v46, %v2947_v56  ;;  %v756_v58 = vpop.f32.mrb[38].mxu0  ;;  %v2246_v59 = vpop.eup %2245  ;;  %v1043_v63 = vadd.f32 1.0, %v2244_v48  ;;  %1414 = vmatmul.mubr.bf16.gmra.mrb[24].mxu1 %v1185_v28  ;;  %v1105_v5 = vmul.f32 %v1041_v44, %v849_v50 }
 0x1e0   : > { %v921_v0 = vmul.f32 0.70710677, %v3074_v45  ;;  %v758_v1 = vpop.f32.mrb[39].mxu0  ;;  %v1044_v3 = vadd.f32 1.0, %v2246_v59  ;;  %v3086_v49 = vadd.f32 %v756_v58, %v2945_v55  ;;  %v1106_v4 = vmul.f32 %v1042_v51, %v850_v60 }
 0x1e1   : > { %v922_v47 = vmul.f32 0.70710677, %v3078_v52  ;;  %v1107_v7 = vmul.f32 %v1043_v63, %v851_v62  ;;  %v3089_v54 = vadd.f32 %v758_v1, %v2947_v56  ;;  %v857_v48 = vmul.f32 0.5, %v3074_v45 }
 0x1e2   : > { %2255 = verf.f32 %v921_v0  ;;  %v1108_v53 = vmul.f32 %v1044_v3, %v852_v2  ;;  %v923_v61 = vmul.f32 0.70710677, %v3086_v49  ;;  %v858_v60 = vmul.f32 0.5, %v3078_v52 }
 0x1e3   : > { %2257 = verf.f32 %v922_v47  ;;  %v924_v57 = vmul.f32 0.70710677, %v3089_v54  ;;  %v1187_v10 = vpack.c.bf16 %v1107_v7, %v1105_v5  ;;  %v859_v62 = vmul.f32 0.5, %v3086_v49 }
 0x1e4   : > { %v2248_v6 = vpop.eup %2247  ;;  %2259 = verf.f32 %v923_v61  ;;  %v1188_v11 = vpack.c.bf16 %v1108_v53, %v1106_v4  ;;  %v860_v2 = vmul.f32 0.5, %v3089_v54 }
 0x1e5   : > { %v2250_v9 = vpop.eup %2249  ;;  %v762_v12 = vpop.f32.mrb[40].mxu0  ;;  %v1045_v8 = vadd.f32 1.0, %v2248_v6  ;;  %2261 = verf.f32 %v924_v57 }
 0x1e6   : > { %v3094_v13 = vadd.f32 %v762_v12, %v2945_v55  ;;  %v764_v14 = vpop.f32.mrb[41].mxu0  ;;  %v2252_v16 = vpop.eup %2251  ;;  %v1046_v19 = vadd.f32 1.0, %v2250_v9  ;;  %1421 = vmatprep.mubr.bf16.mxu1 %v1188_v11 }
 0x1e7   : > { %v3098_v20 = vadd.f32 %v764_v14, %v2947_v56  ;;  %v766_v25 = vpop.f32.mrb[42].mxu0  ;;  %v2254_v26 = vpop.eup %2253  ;;  %v1047_v31 = vadd.f32 1.0, %v2252_v16  ;;  %1422 = vmatmul.mubr.bf16.gmra.mrb[28].mxu1 %v1187_v10  ;;  %v1109_v38 = vmul.f32 %v1045_v8, %v853_v18 }
 0x1e8   : > { %v925_v32 = vmul.f32 0.70710677, %v3094_v13  ;;  %v768_v34 = vpop.f32.mrb[43].mxu0  ;;  %v1048_v36 = vadd.f32 1.0, %v2254_v26  ;;  %v3106_v17 = vadd.f32 %v766_v25, %v2945_v55  ;;  %v1110_v37 = vmul.f32 %v1046_v19, %v854_v27 }
 0x1e9   : > { %v926_v15 = vmul.f32 0.70710677, %v3098_v20  ;;  %v1111_v23 = vmul.f32 %v1047_v31, %v855_v30  ;;  %v3109_v22 = vadd.f32 %v768_v34, %v2947_v56  ;;  %v861_v16 = vmul.f32 0.5, %v3094_v13 }
 0x1ea   : > { %2263 = verf.f32 %v925_v32  ;;  %v1112_v21 = vmul.f32 %v1048_v36, %v856_v35  ;;  %v927_v29 = vmul.f32 0.70710677, %v3106_v17  ;;  %v862_v27 = vmul.f32 0.5, %v3098_v20 }
 0x1eb   : > { %2265 = verf.f32 %v926_v15  ;;  %v928_v24 = vmul.f32 0.70710677, %v3109_v22  ;;  %v1189_v41 = vpack.c.bf16 %v1111_v23, %v1109_v38  ;;  %v863_v30 = vmul.f32 0.5, %v3106_v17 }
 0x1ec   : > { %v2256_v33 = vpop.eup %2255  ;;  %2267 = verf.f32 %v927_v29  ;;  %v1190_v42 = vpack.c.bf16 %v1112_v21, %v1110_v37  ;;  %v864_v35 = vmul.f32 0.5, %v3109_v22 }
 0x1ed   : > { %v2258_v40 = vpop.eup %2257  ;;  %v772_v28 = vpop.f32.mrb[44].mxu0  ;;  %v1049_v43 = vadd.f32 1.0, %v2256_v33  ;;  %2269 = verf.f32 %v928_v24 }
 0x1ee   : > { %v3114_v39 = vadd.f32 %v772_v28, %v2945_v55  ;;  %v774_v44 = vpop.f32.mrb[45].mxu0  ;;  %v2260_v46 = vpop.eup %2259  ;;  %v1050_v50 = vadd.f32 1.0, %v2258_v40  ;;  %1429 = vmatprep.mubr.bf16.mxu1 %v1190_v42 }
 0x1ef   : > { %v3118_v51 = vadd.f32 %v774_v44, %v2947_v56  ;;  %v776_v58 = vpop.f32.mrb[46].mxu0  ;;  %v2262_v59 = vpop.eup %2261  ;;  %v1051_v63 = vadd.f32 1.0, %v2260_v46  ;;  %1430 = vmatmul.mubr.bf16.gmra.mrb[32].mxu1 %v1189_v41  ;;  %v1113_v5 = vmul.f32 %v1049_v43, %v857_v48 }
 0x1f0   : > { %v929_v0 = vmul.f32 0.70710677, %v3114_v39  ;;  %v778_v1 = vpop.f32.mrb[47].mxu0  ;;  %v1052_v3 = vadd.f32 1.0, %v2262_v59  ;;  %v3126_v47 = vadd.f32 %v776_v58, %v2945_v55  ;;  %v1114_v49 = vmul.f32 %v1050_v50, %v858_v60 }
 0x1f1   : > { %v930_v45 = vmul.f32 0.70710677, %v3118_v51  ;;  %v1115_v7 = vmul.f32 %v1051_v63, %v859_v62  ;;  %v3129_v52 = vadd.f32 %v778_v1, %v2947_v56  ;;  %v865_v46 = vmul.f32 0.5, %v3114_v39 }
 0x1f2   : > { %2271 = verf.f32 %v929_v0  ;;  %v1116_v4 = vmul.f32 %v1052_v3, %v860_v2  ;;  %v931_v53 = vmul.f32 0.70710677, %v3126_v47  ;;  %v866_v60 = vmul.f32 0.5, %v3118_v51 }
 0x1f3   : > { %2273 = verf.f32 %v930_v45  ;;  %v932_v54 = vmul.f32 0.70710677, %v3129_v52  ;;  %v1191_v6 = vpack.c.bf16 %v1115_v7, %v1113_v5  ;;  %v867_v62 = vmul.f32 0.5, %v3126_v47 }
 0x1f4   : > { %v2264_v61 = vpop.eup %2263  ;;  %2275 = verf.f32 %v931_v53  ;;  %v1192_v9 = vpack.c.bf16 %v1116_v4, %v1114_v49  ;;  %v868_v2 = vmul.f32 0.5, %v3129_v52 }
 0x1f5   : > { %v2266_v57 = vpop.eup %2265  ;;  %v782_v10 = vpop.f32.mrb[48].mxu0  ;;  %v1053_v12 = vadd.f32 1.0, %v2264_v61  ;;  %2277 = verf.f32 %v932_v54 }
 0x1f6   : > { %v3134_v11 = vadd.f32 %v782_v10, %v2945_v55  ;;  %v784_v8 = vpop.f32.mrb[49].mxu0  ;;  %v2268_v14 = vpop.eup %2267  ;;  %v1054_v18 = vadd.f32 1.0, %v2266_v57  ;;  %1437 = vmatprep.mubr.bf16.mxu1 %v1192_v9 }
 0x1f7   : > { %v3138_v19 = vadd.f32 %v784_v8, %v2947_v56  ;;  %v786_v25 = vpop.f32.mrb[50].mxu0  ;;  %v2270_v26 = vpop.eup %2269  ;;  %v1055_v31 = vadd.f32 1.0, %v2268_v14  ;;  %1438 = vmatmul.mubr.bf16.gmra.mrb[36].mxu1 %v1191_v6  ;;  %v1117_v38 = vmul.f32 %v1053_v12, %v861_v16 }
 0x1f8   : > { %v933_v32 = vmul.f32 0.70710677, %v3134_v11  ;;  %v788_v34 = vpop.f32.mrb[51].mxu0  ;;  %v1056_v36 = vadd.f32 1.0, %v2270_v26  ;;  %v3146_v15 = vadd.f32 %v786_v25, %v2945_v55  ;;  %v1118_v17 = vmul.f32 %v1054_v18, %v862_v27 }
 0x1f9   : > { %v934_v13 = vmul.f32 0.70710677, %v3138_v19  ;;  %v1119_v23 = vmul.f32 %v1055_v31, %v863_v30  ;;  %v3149_v20 = vadd.f32 %v788_v34, %v2947_v56  ;;  %v869_v14 = vmul.f32 0.5, %v3134_v11 }
 0x1fa   : > { %2279 = verf.f32 %v933_v32  ;;  %v1120_v37 = vmul.f32 %v1056_v36, %v864_v35  ;;  %v935_v21 = vmul.f32 0.70710677, %v3146_v15  ;;  %v870_v27 = vmul.f32 0.5, %v3138_v19 }
 0x1fb   : > { %2281 = verf.f32 %v934_v13  ;;  %v936_v22 = vmul.f32 0.70710677, %v3149_v20  ;;  %v1193_v33 = vpack.c.bf16 %v1119_v23, %v1117_v38  ;;  %v871_v30 = vmul.f32 0.5, %v3146_v15 }
 0x1fc   : > { %v2272_v29 = vpop.eup %2271  ;;  %2283 = verf.f32 %v935_v21  ;;  %v1194_v40 = vpack.c.bf16 %v1120_v37, %v1118_v17  ;;  %v872_v35 = vmul.f32 0.5, %v3149_v20 }
 0x1fd   : > { %v2274_v24 = vpop.eup %2273  ;;  %v792_v41 = vpop.f32.mrb[52].mxu0  ;;  %v1057_v28 = vadd.f32 1.0, %v2272_v29  ;;  %2285 = verf.f32 %v936_v22 }
 0x1fe   : > { %v3154_v42 = vadd.f32 %v792_v41, %v2945_v55  ;;  %v794_v43 = vpop.f32.mrb[53].mxu0  ;;  %v2276_v44 = vpop.eup %2275  ;;  %v1058_v48 = vadd.f32 1.0, %v2274_v24  ;;  %1445 = vmatprep.mubr.bf16.mxu1 %v1194_v40 }
 0x1ff   : > { %v3158_v50 = vadd.f32 %v794_v43, %v2947_v56  ;;  %v796_v58 = vpop.f32.mrb[54].mxu0  ;;  %v2278_v59 = vpop.eup %2277  ;;  %v1059_v63 = vadd.f32 1.0, %v2276_v44  ;;  %1446 = vmatmul.mubr.bf16.gmra.mrb[40].mxu1 %v1193_v33  ;;  %v1121_v5 = vmul.f32 %v1057_v28, %v865_v46 }
 0x200   : > { %v937_v0 = vmul.f32 0.70710677, %v3154_v42  ;;  %v798_v1 = vpop.f32.mrb[55].mxu0  ;;  %v1060_v3 = vadd.f32 1.0, %v2278_v59  ;;  %v3166_v45 = vadd.f32 %v796_v58, %v2945_v55  ;;  %v1122_v47 = vmul.f32 %v1058_v48, %v866_v60 }
 0x201   : > { %v938_v39 = vmul.f32 0.70710677, %v3158_v50  ;;  %v1123_v7 = vmul.f32 %v1059_v63, %v867_v62  ;;  %v3169_v51 = vadd.f32 %v798_v1, %v2947_v56  ;;  %v873_v44 = vmul.f32 0.5, %v3154_v42 }
 0x202   : > { %2287 = verf.f32 %v937_v0  ;;  %v1124_v49 = vmul.f32 %v1060_v3, %v868_v2  ;;  %v939_v4 = vmul.f32 0.70710677, %v3166_v45  ;;  %v874_v60 = vmul.f32 0.5, %v3158_v50 }
 0x203   : > { %2289 = verf.f32 %v938_v39  ;;  %v940_v52 = vmul.f32 0.70710677, %v3169_v51  ;;  %v1195_v61 = vpack.c.bf16 %v1123_v7, %v1121_v5  ;;  %v875_v62 = vmul.f32 0.5, %v3166_v45 }
 0x204   : > { %v2280_v53 = vpop.eup %2279  ;;  %2291 = verf.f32 %v939_v4  ;;  %v1196_v57 = vpack.c.bf16 %v1124_v49, %v1122_v47  ;;  %v876_v2 = vmul.f32 0.5, %v3169_v51 }
 0x205   : > { %v2282_v54 = vpop.eup %2281  ;;  %v802_v6 = vpop.f32.mrb[56].mxu0  ;;  %v1061_v10 = vadd.f32 1.0, %v2280_v53  ;;  %2293 = verf.f32 %v940_v52 }
 0x206   : > { %v3174_v9 = vadd.f32 %v802_v6, %v2945_v55  ;;  %v804_v12 = vpop.f32.mrb[57].mxu0  ;;  %v2284_v8 = vpop.eup %2283  ;;  %v1062_v16 = vadd.f32 1.0, %v2282_v54  ;;  %1453 = vmatprep.mubr.bf16.mxu1 %v1196_v57 }
 0x207   : > { %v3178_v18 = vadd.f32 %v804_v12, %v2947_v56  ;;  %v806_v25 = vpop.f32.mrb[58].mxu0  ;;  %v2286_v26 = vpop.eup %2285  ;;  %v1063_v31 = vadd.f32 1.0, %v2284_v8  ;;  %1454 = vmatmul.mubr.bf16.gmra.mrb[44].mxu1 %v1195_v61  ;;  %v1125_v38 = vmul.f32 %v1061_v10, %v869_v14 }
 0x208   : > { %v941_v32 = vmul.f32 0.70710677, %v3174_v9  ;;  %v808_v34 = vpop.f32.mrb[59].mxu0  ;;  %v1064_v36 = vadd.f32 1.0, %v2286_v26  ;;  %v807_v13 = vadd.f32 %v806_v25, %v2945_v55  ;;  %v1126_v19 = vmul.f32 %v1062_v16, %v870_v27 }
 0x209   : > { %v942_v11 = vmul.f32 0.70710677, %v3178_v18  ;;  %v1127_v23 = vmul.f32 %v1063_v31, %v871_v30  ;;  %v809_v17 = vadd.f32 %v808_v34, %v2947_v56  ;;  %v877_v10 = vmul.f32 0.5, %v3174_v9 }
 0x20a   : > { %2295 = verf.f32 %v941_v32  ;;  %v1128_v37 = vmul.f32 %v1064_v36, %v872_v35  ;;  %v943_v15 = vmul.f32 0.70710677, %v807_v13  ;;  %v879_v12 = vmul.f32 0.5, %v807_v13 }
 0x20b   : > { %2297 = verf.f32 %v942_v11  ;;  %v944_v29 = vmul.f32 0.70710677, %v809_v17  ;;  %v1197_v22 = vpack.c.bf16 %v1127_v23, %v1125_v38  ;;  %v878_v8 = vmul.f32 0.5, %v3178_v18 }
 0x20c   : > { %v2288_v21 = vpop.eup %2287  ;;  %2299 = verf.f32 %v943_v15  ;;  %v1198_v24 = vpack.c.bf16 %v1128_v37, %v1126_v19  ;;  %v880_v14 = vmul.f32 0.5, %v809_v17 }
 0x20d   : > { %v2290_v33 = vpop.eup %2289  ;;  %v812_v20 = vpop.f32.mrb[60].mxu0  ;;  %v1065_v41 = vadd.f32 1.0, %v2288_v21  ;;  %2301 = verf.f32 %v944_v29 }
 0x20e   : > { %v813_v40 = vadd.f32 %v812_v20, %v2945_v55  ;;  %v814_v28 = vpop.f32.mrb[61].mxu0  ;;  %v2292_v43 = vpop.eup %2291  ;;  %v1066_v46 = vadd.f32 1.0, %v2290_v33  ;;  %1461 = vmatprep.mubr.bf16.mxu1 %v1198_v24 }
 0x20f   : > { %v815_v48 = vadd.f32 %v814_v28, %v2947_v56  ;;  %v816_v58 = vpop.f32.mrb[62].mxu0  ;;  %v2294_v59 = vpop.eup %2293  ;;  %v1067_v63 = vadd.f32 1.0, %v2292_v43  ;;  %1462 = vmatmul.mubr.bf16.gmra.mrb[48].mxu1 %v1197_v22  ;;  %v1129_v5 = vmul.f32 %v1065_v41, %v873_v44  ;;  %v1141_v41 = vld [vmem:[#allocation2] sm:$0xff] }
 0x210   : > { %v945_v0 = vmul.f32 0.70710677, %v813_v40  ;;  %v818_v1 = vpop.f32.mrb[63].mxu0  ;;  %v1068_v3 = vadd.f32 1.0, %v2294_v59  ;;  %v817_v42 = vadd.f32 %v816_v58, %v2945_v55  ;;  %v1130_v49 = vmul.f32 %v1066_v46, %v874_v60 }
 0x211   : > { %v946_v39 = vmul.f32 0.70710677, %v815_v48  ;;  %v1131_v7 = vmul.f32 %v1067_v63, %v875_v62  ;;  %v819_v47 = vadd.f32 %v818_v1, %v2947_v56  ;;  %v881_v13 = vmul.f32 0.5, %v813_v40  ;;  %v1142_v40 = vld [vmem:[#allocation2 + $0x8] sm:$0xff]  ;;  %v1143_v62 = vld [vmem:[#allocation2 + $0x10] sm:$0xff] }
 0x212   : > { %2303 = verf.f32 %v945_v0  ;;  %v1132_v4 = vmul.f32 %v1068_v3, %v876_v2  ;;  %v947_v50 = vmul.f32 0.70710677, %v817_v42  ;;  %v883_v23 = vmul.f32 0.5, %v817_v42  ;;  %v1144_v2 = vld [vmem:[#allocation2 + $0x18] sm:$0xff] }
 0x213   : > { %2305 = verf.f32 %v946_v39  ;;  %v948_v53 = vmul.f32 0.70710677, %v819_v47  ;;  %v1199_v52 = vpack.c.bf16 %v1131_v7, %v1129_v5  ;;  %v882_v18 = vmul.f32 0.5, %v815_v48 }
 0x214   : > { %v2296_v45 = vpop.eup %2295  ;;  %2307 = verf.f32 %v947_v50  ;;  %v1200_v54 = vpack.c.bf16 %v1132_v4, %v1130_v49  ;;  %v884_v17 = vmul.f32 0.5, %v819_v47  ;;  %v1145_v47 = vld [vmem:[#allocation2 + $0x20] sm:$0xff] }
 0x215   : > { %v2298_v61 = vpop.eup %2297  ;;  %v1069_v51 = vadd.f32 1.0, %v2296_v45  ;;  %2309 = verf.f32 %v948_v53  ;;  %v1146_v45 = vld [vmem:[#allocation2 + $0x28] sm:$0xff] }
 0x216   : > { %v2300_v6 = vpop.eup %2299  ;;  %v1070_v57 = vadd.f32 1.0, %v2298_v61  ;;  %1469 = vmatprep.mubr.bf16.mxu1 %v1200_v54 }
 0x217   : > { %v2302_v55 = vpop.eup %2301  ;;  %v1071_v56 = vadd.f32 1.0, %v2300_v6  ;;  %1470 = vmatmul.mubr.bf16.gmra.mrb[52].mxu1 %v1199_v52  ;;  %v1133_v25 = vmul.f32 %v1069_v51, %v877_v10  ;;  %v1147_v6 = vld [vmem:[#allocation2 + $0x30] sm:$0xff] }
 0x218   : > { %v1072_v16 = vadd.f32 1.0, %v2302_v55  ;;  %v1134_v27 = vmul.f32 %v1070_v57, %v878_v8 }
 0x219   : > { %v1135_v26 = vmul.f32 %v1071_v56, %v879_v12  ;;  %v1148_v12 = vld [vmem:[#allocation2 + $0x38] sm:$0xff] }
 0x21a   : > { %v1136_v30 = vmul.f32 %v1072_v16, %v880_v14 }
 0x21b   : > { %v1201_v32 = vpack.c.bf16 %v1135_v26, %v1133_v25  ;;  %v1149_v26 = vld [vmem:[#allocation2 + $0x40] sm:$0xff] }
 0x21c   : > { %v2304_v31 = vpop.eup %2303  ;;  %v1202_v35 = vpack.c.bf16 %v1136_v30, %v1134_v27 }
 0x21d   : > { %v2306_v34 = vpop.eup %2305  ;;  %v1073_v36 = vadd.f32 1.0, %v2304_v31 }
 0x21e   : > { %v2308_v11 = vpop.eup %2307  ;;  %v1074_v38 = vadd.f32 1.0, %v2306_v34  ;;  %1477 = vmatprep.mubr.bf16.mxu1 %v1202_v35 }
 0x21f   : > { %v2310_v9 = vpop.eup %2309  ;;  %v1075_v19 = vadd.f32 1.0, %v2308_v11  ;;  %1478 = vmatmul.mubr.bf16.gmra.mrb[56].mxu1 %v1201_v32  ;;  %v1137_v15 = vmul.f32 %v1073_v36, %v881_v13  ;;  %v1150_v32 = vld [vmem:[#allocation2 + $0x48] sm:$0xff] }
 0x220   : > { %v1076_v37 = vadd.f32 1.0, %v2310_v9  ;;  %v1138_v29 = vmul.f32 %v1074_v38, %v882_v18  ;;  %v1151_v9 = vld [vmem:[#allocation2 + $0x50] sm:$0xff]  ;;  %v1152_v18 = vld [vmem:[#allocation2 + $0x58] sm:$0xff] }
 0x221   : > { %v1139_v21 = vmul.f32 %v1075_v19, %v883_v23 }
 0x222   : > { %v1140_v22 = vmul.f32 %v1076_v37, %v884_v17 }
 0x223   : > { %v1203_v33 = vpack.c.bf16 %v1139_v21, %v1137_v15 }
 0x224   : > { %v1204_v20 = vpack.c.bf16 %v1140_v22, %v1138_v29  ;;  %v1153_v22 = vld [vmem:[#allocation2 + $0x60] sm:$0xff] }
 0x226   : > { %1485 = vmatprep.mubr.bf16.mxu1 %v1204_v20 }
 0x227   : > { %1486 = vmatmul.mubr.bf16.gmra.mrb[60].mxu1 %v1203_v33 }
 0x282   : > { %v1910_v24 = vpop.f32.mrb[0].mxu1 }
 0x283   : > { %v1911_v28 = vpop.f32.mrb[1].mxu1 }
 0x284   : > { %v1912_v43 = vadd.f32 %v1911_v28, %v1910_v24  ;;  %v1913_v44 = vpop.f32.mrb[2].mxu1 }
 0x285   : > { %v1914_v46 = vpop.f32.mrb[3].mxu1 }
 0x286   : > { %v1494_v58 = vadd.f32 %v1912_v43, %v1141_v41  ;;  %v1915_v59 = vadd.f32 %v1914_v46, %v1913_v44  ;;  %v1154_v41 = vld [vmem:[#allocation2 + $0x68] sm:$0xff] }
 0x288   : > { %1526 = vst [vmem:[#allocation2] sm:$0xff] %v1494_v58  ;;  %v1495_v48 = vadd.f32 %v1915_v59, %v1142_v40  ;;  %v1155_v58 = vld [vmem:[#allocation2 + $0x70] sm:$0xff] }
 0x28a   : > { %1527 = vst [vmem:[#allocation2 + $0x8] sm:$0xff] %v1495_v48  ;;  %v1916_v60 = vpop.f32.mrb[4].mxu1 }
 0x28b   : > { %v1917_v63 = vpop.f32.mrb[5].mxu1 }
 0x28c   : > { %v1918_v0 = vadd.f32 %v1917_v63, %v1916_v60  ;;  %v1919_v1 = vpop.f32.mrb[6].mxu1 }
 0x28d   : > { %v1920_v3 = vpop.f32.mrb[7].mxu1 }
 0x28e   : > { %v1496_v39 = vadd.f32 %v1918_v0, %v1143_v62  ;;  %v1921_v42 = vadd.f32 %v1920_v3, %v1919_v1  ;;  %v1156_v62 = vld [vmem:[#allocation2 + $0x78] sm:$0xff] }
 0x290   : > { %1528 = vst [vmem:[#allocation2 + $0x10] sm:$0xff] %v1496_v39  ;;  %v1497_v5 = vadd.f32 %v1921_v42, %v1144_v2  ;;  %v1157_v39 = vld [vmem:[#allocation2 + $0x80] sm:$0xff] }
 0x292   : > { %1529 = vst [vmem:[#allocation2 + $0x18] sm:$0xff] %v1497_v5  ;;  %v1922_v7 = vpop.f32.mrb[8].mxu1 }
 0x293   : > { %v1923_v49 = vpop.f32.mrb[9].mxu1 }
 0x294   : > { %v1924_v4 = vadd.f32 %v1923_v49, %v1922_v7  ;;  %v1925_v50 = vpop.f32.mrb[10].mxu1 }
 0x295   : > { %v1926_v53 = vpop.f32.mrb[11].mxu1 }
 0x296   : > { %v1498_v52 = vadd.f32 %v1924_v4, %v1145_v47  ;;  %v1927_v61 = vadd.f32 %v1926_v53, %v1925_v50  ;;  %v1158_v47 = vld [vmem:[#allocation2 + $0x88] sm:$0xff] }
 0x298   : > { %1530 = vst [vmem:[#allocation2 + $0x20] sm:$0xff] %v1498_v52  ;;  %v1499_v54 = vadd.f32 %v1927_v61, %v1146_v45  ;;  %v1159_v52 = vld [vmem:[#allocation2 + $0x90] sm:$0xff] }
 0x29a   : > { %1531 = vst [vmem:[#allocation2 + $0x28] sm:$0xff] %v1499_v54  ;;  %v1928_v51 = vpop.f32.mrb[12].mxu1 }
 0x29b   : > { %v1929_v57 = vpop.f32.mrb[13].mxu1 }
 0x29c   : > { %v1930_v55 = vadd.f32 %v1929_v57, %v1928_v51  ;;  %v1931_v10 = vpop.f32.mrb[14].mxu1 }
 0x29d   : > { %v1932_v56 = vpop.f32.mrb[15].mxu1 }
 0x29e   : > { %v1500_v8 = vadd.f32 %v1930_v55, %v1147_v6  ;;  %v1933_v14 = vadd.f32 %v1932_v56, %v1931_v10  ;;  %v1160_v6 = vld [vmem:[#allocation2 + $0x98] sm:$0xff] }
 0x2a0   : > { %1532 = vst [vmem:[#allocation2 + $0x30] sm:$0xff] %v1500_v8  ;;  %v1501_v16 = vadd.f32 %v1933_v14, %v1148_v12  ;;  %v1161_v8 = vld [vmem:[#allocation2 + $0xa0] sm:$0xff] }
 0x2a2   : > { %1533 = vst [vmem:[#allocation2 + $0x38] sm:$0xff] %v1501_v16  ;;  %v1934_v25 = vpop.f32.mrb[16].mxu1 }
 0x2a3   : > { %v1935_v27 = vpop.f32.mrb[17].mxu1 }
 0x2a4   : > { %v1936_v30 = vadd.f32 %v1935_v27, %v1934_v25  ;;  %v1937_v31 = vpop.f32.mrb[18].mxu1 }
 0x2a5   : > { %v1938_v34 = vpop.f32.mrb[19].mxu1 }
 0x2a6   : > { %v1502_v35 = vadd.f32 %v1936_v30, %v1149_v26  ;;  %v1939_v36 = vadd.f32 %v1938_v34, %v1937_v31  ;;  %v1162_v26 = vld [vmem:[#allocation2 + $0xa8] sm:$0xff] }
 0x2a8   : > { %1534 = vst [vmem:[#allocation2 + $0x40] sm:$0xff] %v1502_v35  ;;  %v1503_v11 = vadd.f32 %v1939_v36, %v1150_v32  ;;  %v1163_v35 = vld [vmem:[#allocation2 + $0xb0] sm:$0xff] }
 0x2aa   : > { %1535 = vst [vmem:[#allocation2 + $0x48] sm:$0xff] %v1503_v11  ;;  %v1940_v38 = vpop.f32.mrb[20].mxu1 }
 0x2ab   : > { %v1941_v13 = vpop.f32.mrb[21].mxu1 }
 0x2ac   : > { %v1942_v23 = vadd.f32 %v1941_v13, %v1940_v38  ;;  %v1943_v19 = vpop.f32.mrb[22].mxu1 }
 0x2ad   : > { %v1944_v17 = vpop.f32.mrb[23].mxu1 }
 0x2ae   : > { %v1504_v37 = vadd.f32 %v1942_v23, %v1151_v9  ;;  %v1945_v15 = vadd.f32 %v1944_v17, %v1943_v19  ;;  %v1164_v9 = vld [vmem:[#allocation2 + $0xb8] sm:$0xff] }
 0x2b0   : > { %1536 = vst [vmem:[#allocation2 + $0x50] sm:$0xff] %v1504_v37  ;;  %v1505_v21 = vadd.f32 %v1945_v15, %v1152_v18  ;;  %v1165_v37 = vld [vmem:[#allocation2 + $0xc0] sm:$0xff] }
 0x2b2   : > { %1537 = vst [vmem:[#allocation2 + $0x58] sm:$0xff] %v1505_v21  ;;  %v1946_v29 = vpop.f32.mrb[24].mxu1 }
 0x2b3   : > { %v1947_v33 = vpop.f32.mrb[25].mxu1 }
 0x2b4   : > { %v1948_v20 = vadd.f32 %v1947_v33, %v1946_v29  ;;  %v1949_v24 = vpop.f32.mrb[26].mxu1 }
 0x2b5   : > { %v1950_v28 = vpop.f32.mrb[27].mxu1 }
 0x2b6   : > { %v1506_v43 = vadd.f32 %v1948_v20, %v1153_v22  ;;  %v1951_v44 = vadd.f32 %v1950_v28, %v1949_v24  ;;  %v1166_v22 = vld [vmem:[#allocation2 + $0xc8] sm:$0xff] }
 0x2b8   : > { %1538 = vst [vmem:[#allocation2 + $0x60] sm:$0xff] %v1506_v43  ;;  %v1507_v40 = vadd.f32 %v1951_v44, %v1154_v41  ;;  %v1167_v43 = vld [vmem:[#allocation2 + $0xd0] sm:$0xff] }
 0x2ba   : > { %1539 = vst [vmem:[#allocation2 + $0x68] sm:$0xff] %v1507_v40  ;;  %v1952_v46 = vpop.f32.mrb[28].mxu1 }
 0x2bb   : > { %v1953_v59 = vpop.f32.mrb[29].mxu1 }
 0x2bc   : > { %v1954_v48 = vadd.f32 %v1953_v59, %v1952_v46  ;;  %v1955_v60 = vpop.f32.mrb[30].mxu1 }
 0x2bd   : > { %v1956_v63 = vpop.f32.mrb[31].mxu1 }
 0x2be   : > { %v1508_v0 = vadd.f32 %v1954_v48, %v1155_v58  ;;  %v1957_v1 = vadd.f32 %v1956_v63, %v1955_v60  ;;  %v1168_v58 = vld [vmem:[#allocation2 + $0xd8] sm:$0xff] }
 0x2c0   : > { %1540 = vst [vmem:[#allocation2 + $0x70] sm:$0xff] %v1508_v0  ;;  %v1509_v2 = vadd.f32 %v1957_v1, %v1156_v62  ;;  %v1169_v0 = vld [vmem:[#allocation2 + $0xe0] sm:$0xff] }
 0x2c2   : > { %1541 = vst [vmem:[#allocation2 + $0x78] sm:$0xff] %v1509_v2  ;;  %v1958_v3 = vpop.f32.mrb[32].mxu1 }
 0x2c3   : > { %v1959_v42 = vpop.f32.mrb[33].mxu1 }
 0x2c4   : > { %v1960_v5 = vadd.f32 %v1959_v42, %v1958_v3  ;;  %v1961_v7 = vpop.f32.mrb[34].mxu1 }
 0x2c5   : > { %v1962_v49 = vpop.f32.mrb[35].mxu1 }
 0x2c6   : > { %v1510_v4 = vadd.f32 %v1960_v5, %v1157_v39  ;;  %v1963_v50 = vadd.f32 %v1962_v49, %v1961_v7  ;;  %v1170_v39 = vld [vmem:[#allocation2 + $0xe8] sm:$0xff] }
 0x2c8   : > { %1542 = vst [vmem:[#allocation2 + $0x80] sm:$0xff] %v1510_v4  ;;  %v1511_v45 = vadd.f32 %v1963_v50, %v1158_v47  ;;  %v1171_v4 = vld [vmem:[#allocation2 + $0xf0] sm:$0xff] }
 0x2ca   : > { %1543 = vst [vmem:[#allocation2 + $0x88] sm:$0xff] %v1511_v45  ;;  %v1964_v53 = vpop.f32.mrb[36].mxu1 }
 0x2cb   : > { %v1965_v61 = vpop.f32.mrb[37].mxu1 }
 0x2cc   : > { %v1966_v54 = vadd.f32 %v1965_v61, %v1964_v53  ;;  %v1967_v51 = vpop.f32.mrb[38].mxu1 }
 0x2cd   : > { %v1968_v57 = vpop.f32.mrb[39].mxu1 }
 0x2ce   : > { %v1512_v55 = vadd.f32 %v1966_v54, %v1159_v52  ;;  %v1969_v10 = vadd.f32 %v1968_v57, %v1967_v51  ;;  %v1172_v52 = vld [vmem:[#allocation2 + $0xf8] sm:$0xff]  ;;  %v1562_v57 = vld [vmem:[#allocation2] sm:$0xff] (!%p1883_p2) }
 0x2d0   : > { %1544 = vst [vmem:[#allocation2 + $0x90] sm:$0xff] %v1512_v55  ;;  %v1513_v12 = vadd.f32 %v1969_v10, %v1160_v6  ;;  %v3201_v55 = vld [vmem:[%s3385_s27] ss:$0 sm:$0xff] (!%p1883_p2)  ;;  %v1563_v10 = vld [vmem:[#allocation2 + $0x8] sm:$0xff] (!%p1883_p2) }
 0x2d2   : > { %1545 = vst [vmem:[#allocation2 + $0x98] sm:$0xff] %v1513_v12  ;;  %v1970_v56 = vpop.f32.mrb[40].mxu1  ;;  %v1601_v12 = vadd.f32 (!%p1883_p2), %v3201_v55, %v1562_v57 }
 0x2d3   : > { %v1971_v14 = vpop.f32.mrb[41].mxu1 }
 0x2d4   : > { %v1972_v16 = vadd.f32 %v1971_v14, %v1970_v56  ;;  %v1973_v25 = vpop.f32.mrb[42].mxu1  ;;  %v1602_v56 = vadd.f32 (!%p1883_p2), %v3201_v55, %v1563_v10  ;;  %v1565_v14 = vld [vmem:[#allocation2 + $0x18] sm:$0xff] (!%p1883_p2)  ;;  %1633 = vst [vmem:[%s2873_s25] sm:$0xff] (!%p1883_p2), %v1601_v12 }
 0x2d5   : > { %v1974_v27 = vpop.f32.mrb[43].mxu1 }
 0x2d6   : > { %v1514_v30 = vadd.f32 %v1972_v16, %v1161_v8  ;;  %v1975_v31 = vadd.f32 %v1974_v27, %v1973_v25  ;;  %v1564_v8 = vld [vmem:[#allocation2 + $0x10] sm:$0xff] (!%p1883_p2)  ;;  %v1566_v16 = vld [vmem:[#allocation2 + $0x20] sm:$0xff] (!%p1883_p2)  ;;  %1634 = vst [vmem:[%s2873_s25 + $0x8] sm:$0xff] (!%p1883_p2), %v1602_v56 }
 0x2d7   : > { %v1603_v25 = vadd.f32 (!%p1883_p2), %v3201_v55, %v1564_v8  ;;  %v1605_v27 = vadd.f32 (!%p1883_p2), %v3201_v55, %v1566_v16 }
 0x2d8   : > { %1546 = vst [vmem:[#allocation2 + $0xa0] sm:$0xff] %v1514_v30  ;;  %v1515_v32 = vadd.f32 %v1975_v31, %v1162_v26  ;;  %v1604_v26 = vadd.f32 (!%p1883_p2), %v3201_v55, %v1565_v14  ;;  %v1567_v30 = vld [vmem:[#allocation2 + $0x28] sm:$0xff] (!%p1883_p2)  ;;  %v1568_v31 = vld [vmem:[#allocation2 + $0x30] sm:$0xff] (!%p1883_p2) }
 0x2d9   : > { %1635 = vst [vmem:[%s2873_s25 + $0x10] sm:$0xff] (!%p1883_p2), %v1603_v25  ;;  %1637 = vst [vmem:[%s2873_s25 + $0x20] sm:$0xff] (!%p1883_p2), %v1605_v27 }
 0x2da   : > { %1547 = vst [vmem:[#allocation2 + $0xa8] sm:$0xff] %v1515_v32  ;;  %v1976_v34 = vpop.f32.mrb[44].mxu1  ;;  %v1569_v32 = vld [vmem:[#allocation2 + $0x38] sm:$0xff] (!%p1883_p2)  ;;  %1636 = vst [vmem:[%s2873_s25 + $0x18] sm:$0xff] (!%p1883_p2), %v1604_v26 }
 0x2db   : > { %v1977_v36 = vpop.f32.mrb[45].mxu1 }
 0x2dc   : > { %v1978_v11 = vadd.f32 %v1977_v36, %v1976_v34  ;;  %v1979_v38 = vpop.f32.mrb[46].mxu1  ;;  %v1606_v34 = vadd.f32 (!%p1883_p2), %v3201_v55, %v1567_v30  ;;  %v1608_v36 = vadd.f32 (!%p1883_p2), %v3201_v55, %v1569_v32 }
 0x2dd   : > { %v1980_v13 = vpop.f32.mrb[47].mxu1 }
 0x2de   : > { %v1516_v23 = vadd.f32 %v1978_v11, %v1163_v35  ;;  %v1981_v19 = vadd.f32 %v1980_v13, %v1979_v38  ;;  %v1607_v35 = vadd.f32 (!%p1883_p2), %v3201_v55, %v1568_v31  ;;  %v1570_v11 = vld [vmem:[#allocation2 + $0x40] sm:$0xff] (!%p1883_p2)  ;;  %v1571_v38 = vld [vmem:[#allocation2 + $0x48] sm:$0xff] (!%p1883_p2)  ;;  %1638 = vst [vmem:[%s2873_s25 + $0x28] sm:$0xff] (!%p1883_p2), %v1606_v34  ;;  %1640 = vst [vmem:[%s2873_s25 + $0x38] sm:$0xff] (!%p1883_p2), %v1608_v36 }
 0x2df   : > { %v1609_v13 = vadd.f32 (!%p1883_p2), %v3201_v55, %v1570_v11 }
 0x2e0   : > { %1548 = vst [vmem:[#allocation2 + $0xb0] sm:$0xff] %v1516_v23  ;;  %v1517_v18 = vadd.f32 %v1981_v19, %v1164_v9  ;;  %v1572_v9 = vld [vmem:[#allocation2 + $0x50] sm:$0xff] (!%p1883_p2)  ;;  %v1610_v23 = vadd.f32 (!%p1883_p2), %v3201_v55, %v1571_v38  ;;  %1639 = vst [vmem:[%s2873_s25 + $0x30] sm:$0xff] (!%p1883_p2), %v1607_v35 }
 0x2e1   : > { %v1611_v19 = vadd.f32 (!%p1883_p2), %v3201_v55, %v1572_v9  ;;  %1641 = vst [vmem:[%s2873_s25 + $0x40] sm:$0xff] (!%p1883_p2), %v1609_v13 }
 0x2e2   : > { %1549 = vst [vmem:[#allocation2 + $0xb8] sm:$0xff] %v1517_v18  ;;  %v1982_v17 = vpop.f32.mrb[48].mxu1  ;;  %v1573_v18 = vld [vmem:[#allocation2 + $0x58] sm:$0xff] (!%p1883_p2)  ;;  %1642 = vst [vmem:[%s2873_s25 + $0x48] sm:$0xff] (!%p1883_p2), %v1610_v23 }
 0x2e3   : > { %v1983_v15 = vpop.f32.mrb[49].mxu1  ;;  %1643 = vst [vmem:[%s2873_s25 + $0x50] sm:$0xff] (!%p1883_p2), %v1611_v19 }
 0x2e4   : > { %v1984_v21 = vadd.f32 %v1983_v15, %v1982_v17  ;;  %v1985_v29 = vpop.f32.mrb[50].mxu1  ;;  %v1574_v17 = vld [vmem:[#allocation2 + $0x60] sm:$0xff] (!%p1883_p2)  ;;  %v1612_v15 = vadd.f32 (!%p1883_p2), %v3201_v55, %v1573_v18 }
 0x2e5   : > { %v1986_v33 = vpop.f32.mrb[51].mxu1 }
 0x2e6   : > { %v1518_v20 = vadd.f32 %v1984_v21, %v1165_v37  ;;  %v1987_v24 = vadd.f32 %v1986_v33, %v1985_v29  ;;  %v1575_v37 = vld [vmem:[#allocation2 + $0x68] sm:$0xff] (!%p1883_p2)  ;;  %v1613_v21 = vadd.f32 (!%p1883_p2), %v3201_v55, %v1574_v17  ;;  %v1577_v33 = vld [vmem:[#allocation2 + $0x78] sm:$0xff] (!%p1883_p2)  ;;  %1644 = vst [vmem:[%s2873_s25 + $0x58] sm:$0xff] (!%p1883_p2), %v1612_v15 }
 0x2e7   : > { %v1614_v29 = vadd.f32 (!%p1883_p2), %v3201_v55, %v1575_v37 }
 0x2e8   : > { %1550 = vst [vmem:[#allocation2 + $0xc0] sm:$0xff] %v1518_v20  ;;  %v1519_v41 = vadd.f32 %v1987_v24, %v1166_v22  ;;  %v1576_v22 = vld [vmem:[#allocation2 + $0x70] sm:$0xff] (!%p1883_p2)  ;;  %v1578_v20 = vld [vmem:[#allocation2 + $0x80] sm:$0xff] (!%p1883_p2)  ;;  %1645 = vst [vmem:[%s2873_s25 + $0x60] sm:$0xff] (!%p1883_p2), %v1613_v21 }
 0x2e9   : > { %v1615_v24 = vadd.f32 (!%p1883_p2), %v3201_v55, %v1576_v22  ;;  %1646 = vst [vmem:[%s2873_s25 + $0x68] sm:$0xff] (!%p1883_p2), %v1614_v29 }
 0x2ea   : > { %1551 = vst [vmem:[#allocation2 + $0xc8] sm:$0xff] %v1519_v41  ;;  %v1988_v28 = vpop.f32.mrb[52].mxu1  ;;  %v1616_v41 = vadd.f32 (!%p1883_p2), %v3201_v55, %v1577_v33 }
 0x2eb   : > { %v1989_v44 = vpop.f32.mrb[53].mxu1  ;;  %1647 = vst [vmem:[%s2873_s25 + $0x70] sm:$0xff] (!%p1883_p2), %v1615_v24 }
 0x2ec   : > { %v1990_v40 = vadd.f32 %v1989_v44, %v1988_v28  ;;  %v1991_v46 = vpop.f32.mrb[54].mxu1  ;;  %v1617_v28 = vadd.f32 (!%p1883_p2), %v3201_v55, %v1578_v20  ;;  %v1580_v44 = vld [vmem:[#allocation2 + $0x90] sm:$0xff] (!%p1883_p2)  ;;  %1648 = vst [vmem:[%s2873_s25 + $0x78] sm:$0xff] (!%p1883_p2), %v1616_v41 }
 0x2ed   : > { %v1992_v59 = vpop.f32.mrb[55].mxu1 }
 0x2ee   : > { %v1520_v48 = vadd.f32 %v1990_v40, %v1167_v43  ;;  %v1993_v60 = vadd.f32 %v1992_v59, %v1991_v46  ;;  %v1579_v43 = vld [vmem:[#allocation2 + $0x88] sm:$0xff] (!%p1883_p2)  ;;  %v1581_v40 = vld [vmem:[#allocation2 + $0x98] sm:$0xff] (!%p1883_p2)  ;;  %1649 = vst [vmem:[%s2873_s25 + $0x80] sm:$0xff] (!%p1883_p2), %v1617_v28 }
 0x2ef   : > { %v1618_v46 = vadd.f32 (!%p1883_p2), %v3201_v55, %v1579_v43  ;;  %v1620_v59 = vadd.f32 (!%p1883_p2), %v3201_v55, %v1581_v40 }
 0x2f0   : > { %1552 = vst [vmem:[#allocation2 + $0xd0] sm:$0xff] %v1520_v48  ;;  %v1521_v62 = vadd.f32 %v1993_v60, %v1168_v58  ;;  %v1619_v58 = vadd.f32 (!%p1883_p2), %v3201_v55, %v1580_v44  ;;  %v1582_v48 = vld [vmem:[#allocation2 + $0xa0] sm:$0xff] (!%p1883_p2)  ;;  %v1583_v60 = vld [vmem:[#allocation2 + $0xa8] sm:$0xff] (!%p1883_p2) }
 0x2f1   : > { %1650 = vst [vmem:[%s2873_s25 + $0x88] sm:$0xff] (!%p1883_p2), %v1618_v46  ;;  %1652 = vst [vmem:[%s2873_s25 + $0x98] sm:$0xff] (!%p1883_p2), %v1620_v59 }
 0x2f2   : > { %1553 = vst [vmem:[#allocation2 + $0xd8] sm:$0xff] %v1521_v62  ;;  %v1994_v63 = vpop.f32.mrb[56].mxu1  ;;  %v1584_v62 = vld [vmem:[#allocation2 + $0xb0] sm:$0xff] (!%p1883_p2)  ;;  %1651 = vst [vmem:[%s2873_s25 + $0x90] sm:$0xff] (!%p1883_p2), %v1619_v58 }
 0x2f3   : > { %v1995_v1 = vpop.f32.mrb[57].mxu1 }
 0x2f4   : > { %v1996_v2 = vadd.f32 %v1995_v1, %v1994_v63  ;;  %v1997_v3 = vpop.f32.mrb[58].mxu1  ;;  %v1621_v63 = vadd.f32 (!%p1883_p2), %v3201_v55, %v1582_v48  ;;  %v1623_v1 = vadd.f32 (!%p1883_p2), %v3201_v55, %v1584_v62 }
 0x2f5   : > { %v1998_v42 = vpop.f32.mrb[59].mxu1 }
 0x2f6   : > { %v1522_v5 = vadd.f32 %v1996_v2, %v1169_v0  ;;  %v1999_v7 = vadd.f32 %v1998_v42, %v1997_v3  ;;  %v1622_v0 = vadd.f32 (!%p1883_p2), %v3201_v55, %v1583_v60  ;;  %v1585_v2 = vld [vmem:[#allocation2 + $0xb8] sm:$0xff] (!%p1883_p2)  ;;  %v1586_v3 = vld [vmem:[#allocation2 + $0xc0] sm:$0xff] (!%p1883_p2)  ;;  %1653 = vst [vmem:[%s2873_s25 + $0xa0] sm:$0xff] (!%p1883_p2), %v1621_v63  ;;  %1655 = vst [vmem:[%s2873_s25 + $0xb0] sm:$0xff] (!%p1883_p2), %v1623_v1 }
 0x2f7   : > { %v1624_v42 = vadd.f32 (!%p1883_p2), %v3201_v55, %v1585_v2 }
 0x2f8   : > { %1554 = vst [vmem:[#allocation2 + $0xe0] sm:$0xff] %v1522_v5  ;;  %v1523_v47 = vadd.f32 %v1999_v7, %v1170_v39  ;;  %v1587_v39 = vld [vmem:[#allocation2 + $0xc8] sm:$0xff] (!%p1883_p2)  ;;  %v1625_v5 = vadd.f32 (!%p1883_p2), %v3201_v55, %v1586_v3  ;;  %1654 = vst [vmem:[%s2873_s25 + $0xa8] sm:$0xff] (!%p1883_p2), %v1622_v0 }
 0x2f9   : > { %v1626_v7 = vadd.f32 (!%p1883_p2), %v3201_v55, %v1587_v39  ;;  %1656 = vst [vmem:[%s2873_s25 + $0xb8] sm:$0xff] (!%p1883_p2), %v1624_v42 }
 0x2fa   : > { %1555 = vst [vmem:[#allocation2 + $0xe8] sm:$0xff] %v1523_v47  ;;  %v2000_v49 = vpop.f32.mrb[60].mxu1  ;;  %v1588_v47 = vld [vmem:[#allocation2 + $0xd0] sm:$0xff] (!%p1883_p2)  ;;  %1657 = vst [vmem:[%s2873_s25 + $0xc0] sm:$0xff] (!%p1883_p2), %v1625_v5 }
 0x2fb   : > { %v2001_v50 = vpop.f32.mrb[61].mxu1  ;;  %1658 = vst [vmem:[%s2873_s25 + $0xc8] sm:$0xff] (!%p1883_p2), %v1626_v7 }
 0x2fc   : > { %v2002_v45 = vadd.f32 %v2001_v50, %v2000_v49  ;;  %v2003_v53 = vpop.f32.mrb[62].mxu1  ;;  %1561 = sbr.rel (%p1883_p2) target bundleno = 781 (0x30d), region = 60  ;;  %v1589_v49 = vld [vmem:[#allocation2 + $0xd8] sm:$0xff] (!%p1883_p2)  ;;  %v1627_v50 = vadd.f32 (!%p1883_p2), %v3201_v55, %v1588_v47 }
 0x2fd   : > { %v2004_v61 = vpop.f32.mrb[63].mxu1 }
 0x2fe   : > { %v1524_v54 = vadd.f32 %v2002_v45, %v1171_v4  ;;  %v2005_v51 = vadd.f32 %v2004_v61, %v2003_v53  ;;  %v1628_v45 = vadd.f32 (!%p1883_p2), %v3201_v55, %v1589_v49  ;;  %1659 = vst [vmem:[%s2873_s25 + $0xd0] sm:$0xff] (!%p1883_p2), %v1627_v50 }
 0x2ff   : > { %v1590_v4 = vld [vmem:[#allocation2 + $0xe0] sm:$0xff] (!%p1883_p2) }
 0x300   : > { %1556 = vst [vmem:[#allocation2 + $0xf0] sm:$0xff] %v1524_v54  ;;  %v1525_v6 = vadd.f32 %v2005_v51, %v1172_v52  ;;  %v1629_v53 = vadd.f32 (!%p1883_p2), %v3201_v55, %v1590_v4  ;;  %1660 = vst [vmem:[%s2873_s25 + $0xd8] sm:$0xff] (!%p1883_p2), %v1628_v45 }
 0x301   : > { %v1591_v52 = vld [vmem:[#allocation2 + $0xe8] sm:$0xff] (!%p1883_p2) }
 0x302   : > { %1557 = vst [vmem:[#allocation2 + $0xf8] sm:$0xff] %v1525_v6  ;;  %v1630_v51 = vadd.f32 (!%p1883_p2), %v3201_v55, %v1591_v52  ;;  %1661 = vst [vmem:[%s2873_s25 + $0xe0] sm:$0xff] (!%p1883_p2), %v1629_v53 }
 0x304   : > { %1662 = vst [vmem:[%s2873_s25 + $0xe8] sm:$0xff] %v1630_v51 }
 0x307   : > { %v1592_v61 = vld [vmem:[#allocation2 + $0xf0] sm:$0xff] }
 0x308   : > { %v1631_v6 = vadd.f32 %v3201_v55, %v1592_v61 }
 0x309   : > { %v1593_v54 = vld [vmem:[#allocation2 + $0xf8] sm:$0xff] }
 0x30a   : > { %v1632_v57 = vadd.f32 %v3201_v55, %v1593_v54  ;;  %1663 = vst [vmem:[%s2873_s25 + $0xf0] sm:$0xff] %v1631_v6 }
 0x30c   : > { %1664 = vst [vmem:[%s2873_s25 + $0xf8] sm:$0xff] %v1632_v57 }
 0x30d PF: > { %s3386_s24 = sld [smem:[#allocation15_spill]]  ;;  %s1679_s23 = sshll.u32 %s2873_s25, 4  ;;  %s3274_s23 = int_to_ptr.vmem [resolvable:$true] %s1679_s23 }
 0x30e   : > { %s3387_s6 = sld [smem:[#allocation23_spill]]  ;;  %s1666_s4 = scalar_lea.sflag [#allocation5], %s2845_s20 }
 0x30f   : > { %s2401_s15 = scalar_lea.vmem %s3274_s23, 4096  ;;  %p3388_p11 = scmp.ne.s32.totalorder %s3375_s14, 0 }
 0x310   : > { %p2402_p13 = scmp.ne.s32.totalorder %s3274_s23, %s2401_s15  ;;  %s2539_s13 = smov [#allocation9]  }
 0x311   : > { %s2405_s30 = sshll.u32 %s2539_s13, 4  ;;  %s2406_s30 = int_to_ptr.vmem [resolvable:$false] %s2405_s30 }
 0x312   : > { %p2403_p6 = pnand %p2402_p13, %p3388_p11  ;;  %s2407_s12 = scalar_lea.vmem %s2406_s30, 8192 }
 0x313   : > { %s1893_s11 = sshll.u32 %s3386_s24, 12  ;;  %p2408_p1 = scmp.lt.s32.totalorder %s3274_s23, %s2406_s30 }
 0x314   : > { %s3271_s8 = scalar_lea.hbm %s3387_s6, %s1893_s11  ;;  %p2404_p5 = pneg %p2403_p6 }
 0x315   : > { %p2409_p0 = scmp.lt.s32.totalorder %s2407_s12, %s2401_s15 }
 0x317   : > { %p2410_p9 = por %p2409_p0, %p2408_p1 }
 0x319   : > { %p2411_p12 = pnand %p2410_p9, %p2404_p5 }
 0x31b   : > { %2414 = shalt.err (!%p2411_p12)
}
 0x31c   : > { %s2415_s1 = scalar_lea.hbm %s3271_s8, 4096  ;;  %s2419_s17 = scalar_lea.hbm %s3387_s6, 8192 }
 0x31d   : > { %p2416_p3 = scmp.ne.s32.totalorder %s3271_s8, %s2415_s1  ;;  %p2420_p8 = scmp.lt.u32.totalorder %s3271_s8, %s3387_s6 }
 0x31e   : > { %p2421_p10 = scmp.lt.u32.totalorder %s2419_s17, %s2415_s1  ;;  %p2423_p13 = scmp.lt.u32.totalorder %s2415_s1, %s3271_s8 }
 0x31f   : > { %p2417_p4 = pnand %p2416_p3, %p3388_p11 }
 0x320   : > { %p2422_p2 = por %p2421_p10, %p2420_p8 }
 0x321   : > { %p2418_p7 = pneg %p2417_p4 }
 0x322   : > { %p2424_p6 = por %p2423_p13, %p2422_p2 }
 0x324   : > { %p2425_p5 = pnand %p2424_p6, %p2418_p7 }
 0x326   : > { %2428 = shalt.err (!%p2425_p5)
}
 0x327   : > { %s2540_s18 = smov 128   ;;  %s2541_s27 = smov 8  }
 0x328   : > { %2012 = dma.vmem_to_hbm [thread:$0]  (%p3388_p11), %s3274_s23, 4096, %s3271_s8, %s1666_s4, %s2540_s18, %s2540_s18, %s2541_s27  }
 0x329 PF: > { %p2029_p1 = scmp.ge.s32.totalorder %s2527_s28, 2  ;;  %s1694_s24 = sand.u32 1, %s2499_s21  }
 0x32a   : > { %p3389_p0 = scmp.ne.s32.totalorder %s3377_s5, 0  ;;  %s1695_s11 = scalar_lea.sflag [#allocation5], %s1694_s24 }
 0x32c   : > { %p2025_p9 = pnand %p2029_p1, %p3389_p0 }
 0x32e   : > { %2482 = dma.done.wait (!%p2025_p9), %s1695_s11, 4096  }
 0x32f   : > { %2484 = vsyncadd (!%p2025_p9), %s1695_s11, 4294963200  ;;  %s24_s28 = sadd.s32 1, %s2527_s28   ;;  %s3390_s29 = sld [smem:[#allocation13_spill]] }
 0x330   : > { %p21_p12 = scmp.ge.s32.totalorder %s24_s28, 6   ;;  %s3391_s20 = sld [smem:[#allocation18_spill]] }
 0x331   : > { %s3392_s14 = sld [smem:[#allocation14_spill]]  ;;  %s3393_s23 = sld [smem:[#allocation20_spill]] }
 0x332   : > { %s3394_s25 = sld [smem:[#allocation16_spill]]  ;;  %s3395_s7 = sld [smem:[#allocation17_spill]] }
 0x333   : > { %s3396_s27 = sld [smem:[#allocation19_spill]]  ;;  %s3397_s18 = smov %s2491_s19 }
 0x334   : > { %s3399_s21 = smov %s2503_s22  ;;  %s3401_s24 = smov %s2519_s26 }
 0x335   : > { %s3398_s19 = smov %s3390_s29  ;;  %23 = sbr.rel (!%p21_p12) target bundleno = 15 (0xf), region = 120 }
 0x337   : > { %s3400_s22 = smov %s3392_s14 }
 0x338   : > { %s3402_s26 = smov %s3395_s7 }
 0x33c   :  { %1700 = vsyncpa [#allocation4], 1 }
 0x33d   :  { %1702 = vsyncpa [#allocation4 + $0x1], 1 }
 0x33e   :  { %1703 = vsyncpa [#allocation7], 1 }
 0x33f   :  { %1705 = vsyncpa [#allocation7 + $0x1], 1 }
 0x340   :  { %1706 = vsyncpa [#allocation5], 1 }
 0x341   :  { %1708 = vsyncpa [#allocation5 + $0x1], 1 }

</bundles_post_ra>
